<compile_context>
chip_gen: v6e
topology: v6e:2x2x1
jax: 0.10.0
libtpu: 0.0.40
codegen_flags: <defaults>
</compile_context>

<pallas_src>
import jax
import jax.numpy as jnp
import numpy as np
from jax import lax
from jax.experimental import pallas as pl
from jax.experimental.pallas import tpu as pltpu


def _ppeg_kernel(x_ref, w_ref, b_ref, out_ref, xp_ref, stg_ref):
    # x_ref  : (1, 1+H*W, CT)  input sequence block (cls token + image rows)
    # w_ref  : (49, CT)        fused effective 7x7 taps (+residual on tap 24)
    # b_ref  : (1, CT)         summed bias of the three convs
    # out_ref: (1, 1+H*W, CT)  output sequence block (cls passthrough fused)
    # xp_ref : VMEM (H+6, Wp, CT) scratch, input dtype, zero halo
    # stg_ref: VMEM (H, W, CT)    staging for finished output rows
    H, W, CT = stg_ref.shape
    Wp = xp_ref.shape[1]

    # ---- prologue: halo-only zeroing + interior copy (aligned column 0) ----
    xp_ref[0:3, :, :] = jnp.zeros((3, Wp, CT), xp_ref.dtype)
    xp_ref[H + 3:, :, :] = jnp.zeros((3, Wp, CT), xp_ref.dtype)
    if Wp > W:
        xp_ref[3:H + 3, W:, :] = jnp.zeros((H, Wp - W, CT), xp_ref.dtype)
    for y in range(H):
        xp_ref[3 + y, 0:W, :] = x_ref[0, 1 + y * W:1 + (y + 1) * W, :]

    # ---- hoisted weights / bias (49 taps = 7 f32 vregs, loaded once) -------
    w = w_ref[...].astype(jnp.float32)          # (49, CT)
    bias = b_ref[...].astype(jnp.float32)       # (1, CT)

    # dx-groups bound live accumulators (<= 3 * ceil(Wp/8) vregs) while each
    # input row is loaded only 3x per output row (vld slots have slack).
    dx_groups = ((0, 1, 2), (3, 4), (5, 6))

    def row_body(y, carry):
        out_acc = None
        for grp in dx_groups:
            accs = [jnp.zeros((Wp, CT), jnp.float32) for _ in grp]
            for dy in range(7):
                row = xp_ref[y + dy].astype(jnp.float32)        # (Wp, CT)
                for i, dx in enumerate(grp):
                    t = 7 * dy + dx
                    accs[i] = accs[i] + row * w[t:t + 1]        # (Wp,CT)*(1,CT)
            for i, dx in enumerate(grp):
                sh = (3 - dx) % Wp                               # static shift
                shifted = accs[i] if sh == 0 else pltpu.roll(accs[i], shift=sh, axis=0)
                out_acc = shifted if out_acc is None else out_acc + shifted
        out_acc = out_acc + bias
        stg_ref[y, :, :] = out_acc[:W].astype(stg_ref.dtype)    # one store/row
        return carry

    lax.fori_loop(0, H, row_body, 0)

    # ---- fused epilogue: cls passthrough + scatter rows into seq layout ----
    out_ref[0, 0:1, :] = x_ref[0, 0:1, :]
    for y in range(H):
        out_ref[0, 1 + y * W:1 + (y + 1) * W, :] = stg_ref[y]


def ppeg_pallas(x, H, W, params):
    """x: (B, 1 + H*W, C).  Returns (B, 1 + H*W, C), matching PPEG.forward."""
    w7, b7, w5, b5, w3, b3 = params
    B, N, C = x.shape
    assert N == 1 + H * W

    # Fuse the three depthwise filters + residual into one 7x7 filter.
    w_eff = (w7.astype(jnp.float32)
             + jnp.pad(w5.astype(jnp.float32), ((1, 1), (1, 1), (0, 0)))
             + jnp.pad(w3.astype(jnp.float32), ((2, 2), (2, 2), (0, 0))))
    w_eff = w_eff.at[3, 3, :].add(1.0)            # residual on centre tap
    bias = (b7 + b5 + b3).astype(jnp.float32)     # (C,)

    # Lane-dense channel tiling: pad C up to a multiple of 128.
    CT = 128
    C_pad = ((C + CT - 1) // CT) * CT
    pc = C_pad - C
    x_in = jnp.pad(x, ((0, 0), (0, 0), (0, pc))) if pc else x
    if pc:
        w_eff = jnp.pad(w_eff, ((0, 0), (0, 0), (0, pc)))
        bias = jnp.pad(bias, ((0, pc),))
    w_eff = w_eff.reshape(7 * 7, C_pad)
    bias = bias.reshape(1, C_pad)

    Wp = ((W + 3 + 7) // 8) * 8                   # >= W+3, multiple of 8
    Hp = H + 6

    out = pl.pallas_call(
        _ppeg_kernel,
        out_shape=jax.ShapeDtypeStruct((B, N, C_pad), x.dtype),
        grid=(C_pad // CT, B),                    # channel outer, batch inner
        in_specs=[
            pl.BlockSpec((1, N, CT), lambda c, b: (b, 0, c)),
            pl.BlockSpec((7 * 7, CT), lambda c, b: (0, c)),
            pl.BlockSpec((1, CT), lambda c, b: (0, c)),
        ],
        out_specs=pl.BlockSpec((1, N, CT), lambda c, b: (b, 0, c)),
        scratch_shapes=[
            pltpu.VMEM((Hp, Wp, CT), x.dtype),    # zero-haloed image
            pltpu.VMEM((H, W, CT), x.dtype),      # staged output rows
        ],
        compiler_params=pltpu.CompilerParams(
            dimension_semantics=("parallel", "parallel"),
            vmem_limit_bytes=32 * 1024 * 1024),
    )(x_in, w_eff, bias)

    return out[..., :C] if pc else out


def _reference_ppeg(x, H, W, params):
    """Pure-JAX reference (matches PyTorch depthwise conv semantics)."""
    w7, b7, w5, b5, w3, b3 = params
    B, N, C = x.shape
    cls_tok = x[:, :1, :]
    img = x[:, 1:, :].reshape(B, H, W, C)

    def dwconv(inp, w, b):
        kern = w[:, :, None, :]                   # (K, K, 1, C) HWIO grouped
        y = lax.conv_general_dilated(
            inp, kern, window_strides=(1, 1), padding="SAME",
            dimension_numbers=("NHWC", "HWIO", "NHWC"),
            feature_group_count=C)
        return y + b.reshape(1, 1, 1, C)

    y = img + dwconv(img, w7, b7) + dwconv(img, w5, b5) + dwconv(img, w3, b3)
    return jnp.concatenate([cls_tok, y.reshape(B, H * W, C)], axis=1)


def init_params(key, C):
    """Deterministic synthetic parameters for the three depthwise convs."""
    ks = jax.random.split(key, 6)

    def wb(kw, kb, K):
        bound = 1.0 / np.sqrt(K * K)              # fan_in = K*K (groups=dim)
        w = jax.random.uniform(kw, (K, K, C), jnp.float32, -bound, bound)
        b = jax.random.uniform(kb, (C,), jnp.float32, -bound, bound)
        return w, b

    w7, b7 = wb(ks[0], ks[1], 7)
    w5, b5 = wb(ks[2], ks[3], 5)
    w3, b3 = wb(ks[4], ks[5], 3)
    return (w7, b7, w5, b5, w3, b3)


if __name__ == "__main__":
    key = jax.random.PRNGKey(0)
    k_x, k_p = jax.random.split(key)

    # dim=C (padded to 256 -> 2 channel tiles), spatial 8x8 -> seq = 1+64 = 65
    B, C, H, W = 2, 192, 8, 8
    N = 1 + H * W
    x = jax.random.normal(k_x, (B, N, C), jnp.float32)
    params = init_params(k_p, C)

    out = jax.block_until_ready(ppeg_pallas(x, H, W, params))
    ref = jax.block_until_ready(_reference_ppeg(x, H, W, params))
    np.testing.assert_allclose(np.asarray(out), np.asarray(ref),
                               rtol=1e-4, atol=1e-4)
    assert out.shape == (B, N, C)

    print("KERNEL_OK")
</pallas_src>

<mosaic_0001>
module attributes {stable_mosaic.version = 11 : i64} {
  func.func @_ppeg_kernel(%arg0: i32, %arg1: i32, %arg2: memref<1x65x128xf32, #tpu.memory_space<vmem>>, %arg3: memref<49x128xf32, #tpu.memory_space<vmem>>, %arg4: memref<1x128xf32, #tpu.memory_space<vmem>>, %arg5: memref<1x65x128xf32, #tpu.memory_space<vmem>>, %arg6: memref<14x16x128xf32, #tpu.memory_space<vmem>>, %arg7: memref<8x8x128xf32, #tpu.memory_space<vmem>>) attributes {dimension_semantics = [#tpu.dimension_semantics<parallel>, #tpu.dimension_semantics<parallel>], iteration_bounds = array<i64: 2, 2>, scalar_prefetch = 0 : i64, scratch_operands = 2 : i64, tpu.core_type = #tpu.core_type<tc>, window_params = [{transform_indices = @transform_0, window_bounds = array<i64: 1, 65, 128>}, {transform_indices = @transform_1, window_bounds = array<i64: 49, 128>}, {transform_indices = @transform_2, window_bounds = array<i64: 1, 128>}, {transform_indices = @transform_3, window_bounds = array<i64: 1, 65, 128>}]} {
    %cst = arith.constant 0.000000e+00 : f32
    %0 = vector.broadcast %cst : f32 to vector<3x16x128xf32>
    %c0 = arith.constant 0 : index
    %c0_0 = arith.constant 0 : index
    %c0_1 = arith.constant 0 : index
    %1 = vector.load %arg6[%c0, %c0_0, %c0_1] : memref<14x16x128xf32, #tpu.memory_space<vmem>>, vector<3x16x128xf32>
    tpu.vector_store %arg6[%c0, %c0_0, %c0_1], %0 {strides = array<i32>} : memref<14x16x128xf32, #tpu.memory_space<vmem>>, vector<3x16x128xf32>,
    %cst_2 = arith.constant 0.000000e+00 : f32
    %2 = vector.broadcast %cst_2 : f32 to vector<3x16x128xf32>
    %c11 = arith.constant 11 : index
    %c0_3 = arith.constant 0 : index
    %c0_4 = arith.constant 0 : index
    %3 = vector.load %arg6[%c11, %c0_3, %c0_4] : memref<14x16x128xf32, #tpu.memory_space<vmem>>, vector<3x16x128xf32>
    tpu.vector_store %arg6[%c11, %c0_3, %c0_4], %2 {strides = array<i32>} : memref<14x16x128xf32, #tpu.memory_space<vmem>>, vector<3x16x128xf32>,
    %cst_5 = arith.constant 0.000000e+00 : f32
    %4 = vector.broadcast %cst_5 : f32 to vector<8x8x128xf32>
    %c3 = arith.constant 3 : index
    %c8 = arith.constant 8 : index
    %c0_6 = arith.constant 0 : index
    %5 = vector.load %arg6[%c3, %c8, %c0_6] : memref<14x16x128xf32, #tpu.memory_space<vmem>>, vector<8x8x128xf32>
    tpu.vector_store %arg6[%c3, %c8, %c0_6], %4 {strides = array<i32>} : memref<14x16x128xf32, #tpu.memory_space<vmem>>, vector<8x8x128xf32>,
    %c0_7 = arith.constant 0 : index
    %c1 = arith.constant 1 : index
    %c0_8 = arith.constant 0 : index
    %6 = vector.load %arg2[%c0_7, %c1, %c0_8] : memref<1x65x128xf32, #tpu.memory_space<vmem>>, vector<1x8x128xf32>
    %7 = vector.shape_cast %6 : vector<1x8x128xf32> to vector<8x128xf32>
    %c3_9 = arith.constant 3 : index
    %c0_10 = arith.constant 0 : index
    %c0_11 = arith.constant 0 : index
    %8 = vector.load %arg6[%c3_9, %c0_10, %c0_11] : memref<14x16x128xf32, #tpu.memory_space<vmem>>, vector<1x8x128xf32>
    %9 = vector.shape_cast %8 : vector<1x8x128xf32> to vector<8x128xf32>
    %10 = vector.shape_cast %7 : vector<8x128xf32> to vector<1x8x128xf32>
    tpu.vector_store %arg6[%c3_9, %c0_10, %c0_11], %10 {strides = array<i32>} : memref<14x16x128xf32, #tpu.memory_space<vmem>>, vector<1x8x128xf32>,
    %c0_12 = arith.constant 0 : index
    %c9 = arith.constant 9 : index
    %c0_13 = arith.constant 0 : index
    %11 = vector.load %arg2[%c0_12, %c9, %c0_13] : memref<1x65x128xf32, #tpu.memory_space<vmem>>, vector<1x8x128xf32>
    %12 = vector.shape_cast %11 : vector<1x8x128xf32> to vector<8x128xf32>
    %c4 = arith.constant 4 : index
    %c0_14 = arith.constant 0 : index
    %c0_15 = arith.constant 0 : index
    %13 = vector.load %arg6[%c4, %c0_14, %c0_15] : memref<14x16x128xf32, #tpu.memory_space<vmem>>, vector<1x8x128xf32>
    %14 = vector.shape_cast %13 : vector<1x8x128xf32> to vector<8x128xf32>
    %15 = vector.shape_cast %12 : vector<8x128xf32> to vector<1x8x128xf32>
    tpu.vector_store %arg6[%c4, %c0_14, %c0_15], %15 {strides = array<i32>} : memref<14x16x128xf32, #tpu.memory_space<vmem>>, vector<1x8x128xf32>,
    %c0_16 = arith.constant 0 : index
    %c17 = arith.constant 17 : index
    %c0_17 = arith.constant 0 : index
    %16 = vector.load %arg2[%c0_16, %c17, %c0_17] : memref<1x65x128xf32, #tpu.memory_space<vmem>>, vector<1x8x128xf32>
    %17 = vector.shape_cast %16 : vector<1x8x128xf32> to vector<8x128xf32>
    %c5 = arith.constant 5 : index
    %c0_18 = arith.constant 0 : index
    %c0_19 = arith.constant 0 : index
    %18 = vector.load %arg6[%c5, %c0_18, %c0_19] : memref<14x16x128xf32, #tpu.memory_space<vmem>>, vector<1x8x128xf32>
    %19 = vector.shape_cast %18 : vector<1x8x128xf32> to vector<8x128xf32>
    %20 = vector.shape_cast %17 : vector<8x128xf32> to vector<1x8x128xf32>
    tpu.vector_store %arg6[%c5, %c0_18, %c0_19], %20 {strides = array<i32>} : memref<14x16x128xf32, #tpu.memory_space<vmem>>, vector<1x8x128xf32>,
    %c0_20 = arith.constant 0 : index
    %c25 = arith.constant 25 : index
    %c0_21 = arith.constant 0 : index
    %21 = vector.load %arg2[%c0_20, %c25, %c0_21] : memref<1x65x128xf32, #tpu.memory_space<vmem>>, vector<1x8x128xf32>
    %22 = vector.shape_cast %21 : vector<1x8x128xf32> to vector<8x128xf32>
    %c6 = arith.constant 6 : index
    %c0_22 = arith.constant 0 : index
    %c0_23 = arith.constant 0 : index
    %23 = vector.load %arg6[%c6, %c0_22, %c0_23] : memref<14x16x128xf32, #tpu.memory_space<vmem>>, vector<1x8x128xf32>
    %24 = vector.shape_cast %23 : vector<1x8x128xf32> to vector<8x128xf32>
    %25 = vector.shape_cast %22 : vector<8x128xf32> to vector<1x8x128xf32>
    tpu.vector_store %arg6[%c6, %c0_22, %c0_23], %25 {strides = array<i32>} : memref<14x16x128xf32, #tpu.memory_space<vmem>>, vector<1x8x128xf32>,
    %c0_24 = arith.constant 0 : index
    %c33 = arith.constant 33 : index
    %c0_25 = arith.constant 0 : index
    %26 = vector.load %arg2[%c0_24, %c33, %c0_25] : memref<1x65x128xf32, #tpu.memory_space<vmem>>, vector<1x8x128xf32>
    %27 = vector.shape_cast %26 : vector<1x8x128xf32> to vector<8x128xf32>
    %c7 = arith.constant 7 : index
    %c0_26 = arith.constant 0 : index
    %c0_27 = arith.constant 0 : index
    %28 = vector.load %arg6[%c7, %c0_26, %c0_27] : memref<14x16x128xf32, #tpu.memory_space<vmem>>, vector<1x8x128xf32>
    %29 = vector.shape_cast %28 : vector<1x8x128xf32> to vector<8x128xf32>
    %30 = vector.shape_cast %27 : vector<8x128xf32> to vector<1x8x128xf32>
    tpu.vector_store %arg6[%c7, %c0_26, %c0_27], %30 {strides = array<i32>} : memref<14x16x128xf32, #tpu.memory_space<vmem>>, vector<1x8x128xf32>,
    %c0_28 = arith.constant 0 : index
    %c41 = arith.constant 41 : index
    %c0_29 = arith.constant 0 : index
    %31 = vector.load %arg2[%c0_28, %c41, %c0_29] : memref<1x65x128xf32, #tpu.memory_space<vmem>>, vector<1x8x128xf32>
    %32 = vector.shape_cast %31 : vector<1x8x128xf32> to vector<8x128xf32>
    %c8_30 = arith.constant 8 : index
    %c0_31 = arith.constant 0 : index
    %c0_32 = arith.constant 0 : index
    %33 = vector.load %arg6[%c8_30, %c0_31, %c0_32] : memref<14x16x128xf32, #tpu.memory_space<vmem>>, vector<1x8x128xf32>
    %34 = vector.shape_cast %33 : vector<1x8x128xf32> to vector<8x128xf32>
    %35 = vector.shape_cast %32 : vector<8x128xf32> to vector<1x8x128xf32>
    tpu.vector_store %arg6[%c8_30, %c0_31, %c0_32], %35 {strides = array<i32>} : memref<14x16x128xf32, #tpu.memory_space<vmem>>, vector<1x8x128xf32>,
    %c0_33 = arith.constant 0 : index
    %c49 = arith.constant 49 : index
    %c0_34 = arith.constant 0 : index
    %36 = vector.load %arg2[%c0_33, %c49, %c0_34] : memref<1x65x128xf32, #tpu.memory_space<vmem>>, vector<1x8x128xf32>
    %37 = vector.shape_cast %36 : vector<1x8x128xf32> to vector<8x128xf32>
    %c9_35 = arith.constant 9 : index
    %c0_36 = arith.constant 0 : index
    %c0_37 = arith.constant 0 : index
    %38 = vector.load %arg6[%c9_35, %c0_36, %c0_37] : memref<14x16x128xf32, #tpu.memory_space<vmem>>, vector<1x8x128xf32>
    %39 = vector.shape_cast %38 : vector<1x8x128xf32> to vector<8x128xf32>
    %40 = vector.shape_cast %37 : vector<8x128xf32> to vector<1x8x128xf32>
    tpu.vector_store %arg6[%c9_35, %c0_36, %c0_37], %40 {strides = array<i32>} : memref<14x16x128xf32, #tpu.memory_space<vmem>>, vector<1x8x128xf32>,
    %c0_38 = arith.constant 0 : index
    %c57 = arith.constant 57 : index
    %c0_39 = arith.constant 0 : index
    %41 = vector.load %arg2[%c0_38, %c57, %c0_39] : memref<1x65x128xf32, #tpu.memory_space<vmem>>, vector<1x8x128xf32>
    %42 = vector.shape_cast %41 : vector<1x8x128xf32> to vector<8x128xf32>
    %c10 = arith.constant 10 : index
    %c0_40 = arith.constant 0 : index
    %c0_41 = arith.constant 0 : index
    %43 = vector.load %arg6[%c10, %c0_40, %c0_41] : memref<14x16x128xf32, #tpu.memory_space<vmem>>, vector<1x8x128xf32>
    %44 = vector.shape_cast %43 : vector<1x8x128xf32> to vector<8x128xf32>
    %45 = vector.shape_cast %42 : vector<8x128xf32> to vector<1x8x128xf32>
    tpu.vector_store %arg6[%c10, %c0_40, %c0_41], %45 {strides = array<i32>} : memref<14x16x128xf32, #tpu.memory_space<vmem>>, vector<1x8x128xf32>,
    %c0_42 = arith.constant 0 : index
    %c0_43 = arith.constant 0 : index
    %46 = vector.load %arg3[%c0_42, %c0_43] : memref<49x128xf32, #tpu.memory_space<vmem>>, vector<49x128xf32>
    %c0_44 = arith.constant 0 : index
    %c0_45 = arith.constant 0 : index
    %47 = vector.load %arg4[%c0_44, %c0_45] : memref<1x128xf32, #tpu.memory_space<vmem>>, vector<1x128xf32>
    %c0_i32 = arith.constant 0 : i32
    %c8_i32 = arith.constant 8 : i32
    %48 = arith.addi %c0_i32, %c8_i32 : i32
    %c1_i32 = arith.constant 1 : i32
    scf.for %arg8 = %c0_i32 to %48 step %c1_i32  : i32 {
      %cst_100 = arith.constant 0.000000e+00 : f32
      %94 = vector.broadcast %cst_100 : f32 to vector<16x128xf32>
      %cst_101 = arith.constant 0.000000e+00 : f32
      %95 = vector.broadcast %cst_101 : f32 to vector<16x128xf32>
      %cst_102 = arith.constant 0.000000e+00 : f32
      %96 = vector.broadcast %cst_102 : f32 to vector<16x128xf32>
      %c0_i32_103 = arith.constant 0 : i32
      %97 = arith.addi %arg8, %c0_i32_103 : i32
      %98 = arith.index_cast %97 : i32 to index
      %c0_104 = arith.constant 0 : index
      %c0_105 = arith.constant 0 : index
      %99 = vector.load %arg6[%98, %c0_104, %c0_105] : memref<14x16x128xf32, #tpu.memory_space<vmem>>, vector<1x16x128xf32>
      %100 = vector.shape_cast %99 : vector<1x16x128xf32> to vector<16x128xf32>
      %101 = vector.extract_strided_slice %46 {offsets = [0, 0], sizes = [1, 128], strides = [1, 1]} : vector<49x128xf32> to vector<1x128xf32>
      %102 = vector.broadcast %101 : vector<1x128xf32> to vector<16x128xf32>
      %103 = arith.mulf %100, %102 : vector<16x128xf32>
      %104 = arith.addf %94, %103 : vector<16x128xf32>
      %105 = vector.extract_strided_slice %46 {offsets = [1, 0], sizes = [1, 128], strides = [1, 1]} : vector<49x128xf32> to vector<1x128xf32>
      %106 = vector.broadcast %105 : vector<1x128xf32> to vector<16x128xf32>
      %107 = arith.mulf %100, %106 : vector<16x128xf32>
      %108 = arith.addf %95, %107 : vector<16x128xf32>
      %109 = vector.extract_strided_slice %46 {offsets = [2, 0], sizes = [1, 128], strides = [1, 1]} : vector<49x128xf32> to vector<1x128xf32>
      %110 = vector.broadcast %109 : vector<1x128xf32> to vector<16x128xf32>
      %111 = arith.mulf %100, %110 : vector<16x128xf32>
      %112 = arith.addf %96, %111 : vector<16x128xf32>
      %c1_i32_106 = arith.constant 1 : i32
      %113 = arith.addi %arg8, %c1_i32_106 : i32
      %114 = arith.index_cast %113 : i32 to index
      %c0_107 = arith.constant 0 : index
      %c0_108 = arith.constant 0 : index
      %115 = vector.load %arg6[%114, %c0_107, %c0_108] : memref<14x16x128xf32, #tpu.memory_space<vmem>>, vector<1x16x128xf32>
      %116 = vector.shape_cast %115 : vector<1x16x128xf32> to vector<16x128xf32>
      %117 = vector.extract_strided_slice %46 {offsets = [7, 0], sizes = [1, 128], strides = [1, 1]} : vector<49x128xf32> to vector<1x128xf32>
      %118 = vector.broadcast %117 : vector<1x128xf32> to vector<16x128xf32>
      %119 = arith.mulf %116, %118 : vector<16x128xf32>
      %120 = arith.addf %104, %119 : vector<16x128xf32>
      %121 = vector.extract_strided_slice %46 {offsets = [8, 0], sizes = [1, 128], strides = [1, 1]} : vector<49x128xf32> to vector<1x128xf32>
      %122 = vector.broadcast %121 : vector<1x128xf32> to vector<16x128xf32>
      %123 = arith.mulf %116, %122 : vector<16x128xf32>
      %124 = arith.addf %108, %123 : vector<16x128xf32>
      %125 = vector.extract_strided_slice %46 {offsets = [9, 0], sizes = [1, 128], strides = [1, 1]} : vector<49x128xf32> to vector<1x128xf32>
      %126 = vector.broadcast %125 : vector<1x128xf32> to vector<16x128xf32>
      %127 = arith.mulf %116, %126 : vector<16x128xf32>
      %128 = arith.addf %112, %127 : vector<16x128xf32>
      %c2_i32 = arith.constant 2 : i32
      %129 = arith.addi %arg8, %c2_i32 : i32
      %130 = arith.index_cast %129 : i32 to index
      %c0_109 = arith.constant 0 : index
      %c0_110 = arith.constant 0 : index
      %131 = vector.load %arg6[%130, %c0_109, %c0_110] : memref<14x16x128xf32, #tpu.memory_space<vmem>>, vector<1x16x128xf32>
      %132 = vector.shape_cast %131 : vector<1x16x128xf32> to vector<16x128xf32>
      %133 = vector.extract_strided_slice %46 {offsets = [14, 0], sizes = [1, 128], strides = [1, 1]} : vector<49x128xf32> to vector<1x128xf32>
      %134 = vector.broadcast %133 : vector<1x128xf32> to vector<16x128xf32>
      %135 = arith.mulf %132, %134 : vector<16x128xf32>
      %136 = arith.addf %120, %135 : vector<16x128xf32>
      %137 = vector.extract_strided_slice %46 {offsets = [15, 0], sizes = [1, 128], strides = [1, 1]} : vector<49x128xf32> to vector<1x128xf32>
      %138 = vector.broadcast %137 : vector<1x128xf32> to vector<16x128xf32>
      %139 = arith.mulf %132, %138 : vector<16x128xf32>
      %140 = arith.addf %124, %139 : vector<16x128xf32>
      %141 = vector.extract_strided_slice %46 {offsets = [16, 0], sizes = [1, 128], strides = [1, 1]} : vector<49x128xf32> to vector<1x128xf32>
      %142 = vector.broadcast %141 : vector<1x128xf32> to vector<16x128xf32>
      %143 = arith.mulf %132, %142 : vector<16x128xf32>
      %144 = arith.addf %128, %143 : vector<16x128xf32>
      %c3_i32 = arith.constant 3 : i32
      %145 = arith.addi %arg8, %c3_i32 : i32
      %146 = arith.index_cast %145 : i32 to index
      %c0_111 = arith.constant 0 : index
      %c0_112 = arith.constant 0 : index
      %147 = vector.load %arg6[%146, %c0_111, %c0_112] : memref<14x16x128xf32, #tpu.memory_space<vmem>>, vector<1x16x128xf32>
      %148 = vector.shape_cast %147 : vector<1x16x128xf32> to vector<16x128xf32>
      %149 = vector.extract_strided_slice %46 {offsets = [21, 0], sizes = [1, 128], strides = [1, 1]} : vector<49x128xf32> to vector<1x128xf32>
      %150 = vector.broadcast %149 : vector<1x128xf32> to vector<16x128xf32>
      %151 = arith.mulf %148, %150 : vector<16x128xf32>
      %152 = arith.addf %136, %151 : vector<16x128xf32>
      %153 = vector.extract_strided_slice %46 {offsets = [22, 0], sizes = [1, 128], strides = [1, 1]} : vector<49x128xf32> to vector<1x128xf32>
      %154 = vector.broadcast %153 : vector<1x128xf32> to vector<16x128xf32>
      %155 = arith.mulf %148, %154 : vector<16x128xf32>
      %156 = arith.addf %140, %155 : vector<16x128xf32>
      %157 = vector.extract_strided_slice %46 {offsets = [23, 0], sizes = [1, 128], strides = [1, 1]} : vector<49x128xf32> to vector<1x128xf32>
      %158 = vector.broadcast %157 : vector<1x128xf32> to vector<16x128xf32>
      %159 = arith.mulf %148, %158 : vector<16x128xf32>
      %160 = arith.addf %144, %159 : vector<16x128xf32>
      %c4_i32 = arith.constant 4 : i32
      %161 = arith.addi %arg8, %c4_i32 : i32
      %162 = arith.index_cast %161 : i32 to index
      %c0_113 = arith.constant 0 : index
      %c0_114 = arith.constant 0 : index
      %163 = vector.load %arg6[%162, %c0_113, %c0_114] : memref<14x16x128xf32, #tpu.memory_space<vmem>>, vector<1x16x128xf32>
      %164 = vector.shape_cast %163 : vector<1x16x128xf32> to vector<16x128xf32>
      %165 = vector.extract_strided_slice %46 {offsets = [28, 0], sizes = [1, 128], strides = [1, 1]} : vector<49x128xf32> to vector<1x128xf32>
      %166 = vector.broadcast %165 : vector<1x128xf32> to vector<16x128xf32>
      %167 = arith.mulf %164, %166 : vector<16x128xf32>
      %168 = arith.addf %152, %167 : vector<16x128xf32>
      %169 = vector.extract_strided_slice %46 {offsets = [29, 0], sizes = [1, 128], strides = [1, 1]} : vector<49x128xf32> to vector<1x128xf32>
      %170 = vector.broadcast %169 : vector<1x128xf32> to vector<16x128xf32>
      %171 = arith.mulf %164, %170 : vector<16x128xf32>
      %172 = arith.addf %156, %171 : vector<16x128xf32>
      %173 = vector.extract_strided_slice %46 {offsets = [30, 0], sizes = [1, 128], strides = [1, 1]} : vector<49x128xf32> to vector<1x128xf32>
      %174 = vector.broadcast %173 : vector<1x128xf32> to vector<16x128xf32>
      %175 = arith.mulf %164, %174 : vector<16x128xf32>
      %176 = arith.addf %160, %175 : vector<16x128xf32>
      %c5_i32 = arith.constant 5 : i32
      %177 = arith.addi %arg8, %c5_i32 : i32
      %178 = arith.index_cast %177 : i32 to index
      %c0_115 = arith.constant 0 : index
      %c0_116 = arith.constant 0 : index
      %179 = vector.load %arg6[%178, %c0_115, %c0_116] : memref<14x16x128xf32, #tpu.memory_space<vmem>>, vector<1x16x128xf32>
      %180 = vector.shape_cast %179 : vector<1x16x128xf32> to vector<16x128xf32>
      %181 = vector.extract_strided_slice %46 {offsets = [35, 0], sizes = [1, 128], strides = [1, 1]} : vector<49x128xf32> to vector<1x128xf32>
      %182 = vector.broadcast %181 : vector<1x128xf32> to vector<16x128xf32>
      %183 = arith.mulf %180, %182 : vector<16x128xf32>
      %184 = arith.addf %168, %183 : vector<16x128xf32>
      %185 = vector.extract_strided_slice %46 {offsets = [36, 0], sizes = [1, 128], strides = [1, 1]} : vector<49x128xf32> to vector<1x128xf32>
      %186 = vector.broadcast %185 : vector<1x128xf32> to vector<16x128xf32>
      %187 = arith.mulf %180, %186 : vector<16x128xf32>
      %188 = arith.addf %172, %187 : vector<16x128xf32>
      %189 = vector.extract_strided_slice %46 {offsets = [37, 0], sizes = [1, 128], strides = [1, 1]} : vector<49x128xf32> to vector<1x128xf32>
      %190 = vector.broadcast %189 : vector<1x128xf32> to vector<16x128xf32>
      %191 = arith.mulf %180, %190 : vector<16x128xf32>
      %192 = arith.addf %176, %191 : vector<16x128xf32>
      %c6_i32 = arith.constant 6 : i32
      %193 = arith.addi %arg8, %c6_i32 : i32
      %194 = arith.index_cast %193 : i32 to index
      %c0_117 = arith.constant 0 : index
      %c0_118 = arith.constant 0 : index
      %195 = vector.load %arg6[%194, %c0_117, %c0_118] : memref<14x16x128xf32, #tpu.memory_space<vmem>>, vector<1x16x128xf32>
      %196 = vector.shape_cast %195 : vector<1x16x128xf32> to vector<16x128xf32>
      %197 = vector.extract_strided_slice %46 {offsets = [42, 0], sizes = [1, 128], strides = [1, 1]} : vector<49x128xf32> to vector<1x128xf32>
      %198 = vector.broadcast %197 : vector<1x128xf32> to vector<16x128xf32>
      %199 = arith.mulf %196, %198 : vector<16x128xf32>
      %200 = arith.addf %184, %199 : vector<16x128xf32>
      %201 = vector.extract_strided_slice %46 {offsets = [43, 0], sizes = [1, 128], strides = [1, 1]} : vector<49x128xf32> to vector<1x128xf32>
      %202 = vector.broadcast %201 : vector<1x128xf32> to vector<16x128xf32>
      %203 = arith.mulf %196, %202 : vector<16x128xf32>
      %204 = arith.addf %188, %203 : vector<16x128xf32>
      %205 = vector.extract_strided_slice %46 {offsets = [44, 0], sizes = [1, 128], strides = [1, 1]} : vector<49x128xf32> to vector<1x128xf32>
      %206 = vector.broadcast %205 : vector<1x128xf32> to vector<16x128xf32>
      %207 = arith.mulf %196, %206 : vector<16x128xf32>
      %208 = arith.addf %192, %207 : vector<16x128xf32>
      %c3_i32_119 = arith.constant 3 : i32
      %209 = tpu.dynamic_rotate %200 by %c3_i32_119 dim 0 : vector<16x128xf32>, i32 -> vector<16x128xf32>
      %c2_i32_120 = arith.constant 2 : i32
      %210 = tpu.dynamic_rotate %204 by %c2_i32_120 dim 0 : vector<16x128xf32>, i32 -> vector<16x128xf32>
      %211 = arith.addf %209, %210 : vector<16x128xf32>
      %c1_i32_121 = arith.constant 1 : i32
      %212 = tpu.dynamic_rotate %208 by %c1_i32_121 dim 0 : vector<16x128xf32>, i32 -> vector<16x128xf32>
      %213 = arith.addf %211, %212 : vector<16x128xf32>
      %cst_122 = arith.constant 0.000000e+00 : f32
      %214 = vector.broadcast %cst_122 : f32 to vector<16x128xf32>
      %cst_123 = arith.constant 0.000000e+00 : f32
      %215 = vector.broadcast %cst_123 : f32 to vector<16x128xf32>
      %c0_i32_124 = arith.constant 0 : i32
      %216 = arith.addi %arg8, %c0_i32_124 : i32
      %217 = arith.index_cast %216 : i32 to index
      %c0_125 = arith.constant 0 : index
      %c0_126 = arith.constant 0 : index
      %218 = vector.load %arg6[%217, %c0_125, %c0_126] : memref<14x16x128xf32, #tpu.memory_space<vmem>>, vector<1x16x128xf32>
      %219 = vector.shape_cast %218 : vector<1x16x128xf32> to vector<16x128xf32>
      %220 = vector.extract_strided_slice %46 {offsets = [3, 0], sizes = [1, 128], strides = [1, 1]} : vector<49x128xf32> to vector<1x128xf32>
      %221 = vector.broadcast %220 : vector<1x128xf32> to vector<16x128xf32>
      %222 = arith.mulf %219, %221 : vector<16x128xf32>
      %223 = arith.addf %214, %222 : vector<16x128xf32>
      %224 = vector.extract_strided_slice %46 {offsets = [4, 0], sizes = [1, 128], strides = [1, 1]} : vector<49x128xf32> to vector<1x128xf32>
      %225 = vector.broadcast %224 : vector<1x128xf32> to vector<16x128xf32>
      %226 = arith.mulf %219, %225 : vector<16x128xf32>
      %227 = arith.addf %215, %226 : vector<16x128xf32>
      %c1_i32_127 = arith.constant 1 : i32
      %228 = arith.addi %arg8, %c1_i32_127 : i32
      %229 = arith.index_cast %228 : i32 to index
      %c0_128 = arith.constant 0 : index
      %c0_129 = arith.constant 0 : index
      %230 = vector.load %arg6[%229, %c0_128, %c0_129] : memref<14x16x128xf32, #tpu.memory_space<vmem>>, vector<1x16x128xf32>
      %231 = vector.shape_cast %230 : vector<1x16x128xf32> to vector<16x128xf32>
      %232 = vector.extract_strided_slice %46 {offsets = [10, 0], sizes = [1, 128], strides = [1, 1]} : vector<49x128xf32> to vector<1x128xf32>
      %233 = vector.broadcast %232 : vector<1x128xf32> to vector<16x128xf32>
      %234 = arith.mulf %231, %233 : vector<16x128xf32>
      %235 = arith.addf %223, %234 : vector<16x128xf32>
      %236 = vector.extract_strided_slice %46 {offsets = [11, 0], sizes = [1, 128], strides = [1, 1]} : vector<49x128xf32> to vector<1x128xf32>
      %237 = vector.broadcast %236 : vector<1x128xf32> to vector<16x128xf32>
      %238 = arith.mulf %231, %237 : vector<16x128xf32>
      %239 = arith.addf %227, %238 : vector<16x128xf32>
      %c2_i32_130 = arith.constant 2 : i32
      %240 = arith.addi %arg8, %c2_i32_130 : i32
      %241 = arith.index_cast %240 : i32 to index
      %c0_131 = arith.constant 0 : index
      %c0_132 = arith.constant 0 : index
      %242 = vector.load %arg6[%241, %c0_131, %c0_132] : memref<14x16x128xf32, #tpu.memory_space<vmem>>, vector<1x16x128xf32>
      %243 = vector.shape_cast %242 : vector<1x16x128xf32> to vector<16x128xf32>
      %244 = vector.extract_strided_slice %46 {offsets = [17, 0], sizes = [1, 128], strides = [1, 1]} : vector<49x128xf32> to vector<1x128xf32>
      %245 = vector.broadcast %244 : vector<1x128xf32> to vector<16x128xf32>
      %246 = arith.mulf %243, %245 : vector<16x128xf32>
      %247 = arith.addf %235, %246 : vector<16x128xf32>
      %248 = vector.extract_strided_slice %46 {offsets = [18, 0], sizes = [1, 128], strides = [1, 1]} : vector<49x128xf32> to vector<1x128xf32>
      %249 = vector.broadcast %248 : vector<1x128xf32> to vector<16x128xf32>
      %250 = arith.mulf %243, %249 : vector<16x128xf32>
      %251 = arith.addf %239, %250 : vector<16x128xf32>
      %c3_i32_133 = arith.constant 3 : i32
      %252 = arith.addi %arg8, %c3_i32_133 : i32
      %253 = arith.index_cast %252 : i32 to index
      %c0_134 = arith.constant 0 : index
      %c0_135 = arith.constant 0 : index
      %254 = vector.load %arg6[%253, %c0_134, %c0_135] : memref<14x16x128xf32, #tpu.memory_space<vmem>>, vector<1x16x128xf32>
      %255 = vector.shape_cast %254 : vector<1x16x128xf32> to vector<16x128xf32>
      %256 = vector.extract_strided_slice %46 {offsets = [24, 0], sizes = [1, 128], strides = [1, 1]} : vector<49x128xf32> to vector<1x128xf32>
      %257 = vector.broadcast %256 : vector<1x128xf32> to vector<16x128xf32>
      %258 = arith.mulf %255, %257 : vector<16x128xf32>
      %259 = arith.addf %247, %258 : vector<16x128xf32>
      %260 = vector.extract_strided_slice %46 {offsets = [25, 0], sizes = [1, 128], strides = [1, 1]} : vector<49x128xf32> to vector<1x128xf32>
      %261 = vector.broadcast %260 : vector<1x128xf32> to vector<16x128xf32>
      %262 = arith.mulf %255, %261 : vector<16x128xf32>
      %263 = arith.addf %251, %262 : vector<16x128xf32>
      %c4_i32_136 = arith.constant 4 : i32
      %264 = arith.addi %arg8, %c4_i32_136 : i32
      %265 = arith.index_cast %264 : i32 to index
      %c0_137 = arith.constant 0 : index
      %c0_138 = arith.constant 0 : index
      %266 = vector.load %arg6[%265, %c0_137, %c0_138] : memref<14x16x128xf32, #tpu.memory_space<vmem>>, vector<1x16x128xf32>
      %267 = vector.shape_cast %266 : vector<1x16x128xf32> to vector<16x128xf32>
      %268 = vector.extract_strided_slice %46 {offsets = [31, 0], sizes = [1, 128], strides = [1, 1]} : vector<49x128xf32> to vector<1x128xf32>
      %269 = vector.broadcast %268 : vector<1x128xf32> to vector<16x128xf32>
      %270 = arith.mulf %267, %269 : vector<16x128xf32>
      %271 = arith.addf %259, %270 : vector<16x128xf32>
      %272 = vector.extract_strided_slice %46 {offsets = [32, 0], sizes = [1, 128], strides = [1, 1]} : vector<49x128xf32> to vector<1x128xf32>
      %273 = vector.broadcast %272 : vector<1x128xf32> to vector<16x128xf32>
      %274 = arith.mulf %267, %273 : vector<16x128xf32>
      %275 = arith.addf %263, %274 : vector<16x128xf32>
      %c5_i32_139 = arith.constant 5 : i32
      %276 = arith.addi %arg8, %c5_i32_139 : i32
      %277 = arith.index_cast %276 : i32 to index
      %c0_140 = arith.constant 0 : index
      %c0_141 = arith.constant 0 : index
      %278 = vector.load %arg6[%277, %c0_140, %c0_141] : memref<14x16x128xf32, #tpu.memory_space<vmem>>, vector<1x16x128xf32>
      %279 = vector.shape_cast %278 : vector<1x16x128xf32> to vector<16x128xf32>
      %280 = vector.extract_strided_slice %46 {offsets = [38, 0], sizes = [1, 128], strides = [1, 1]} : vector<49x128xf32> to vector<1x128xf32>
      %281 = vector.broadcast %280 : vector<1x128xf32> to vector<16x128xf32>
      %282 = arith.mulf %279, %281 : vector<16x128xf32>
      %283 = arith.addf %271, %282 : vector<16x128xf32>
      %284 = vector.extract_strided_slice %46 {offsets = [39, 0], sizes = [1, 128], strides = [1, 1]} : vector<49x128xf32> to vector<1x128xf32>
      %285 = vector.broadcast %284 : vector<1x128xf32> to vector<16x128xf32>
      %286 = arith.mulf %279, %285 : vector<16x128xf32>
      %287 = arith.addf %275, %286 : vector<16x128xf32>
      %c6_i32_142 = arith.constant 6 : i32
      %288 = arith.addi %arg8, %c6_i32_142 : i32
      %289 = arith.index_cast %288 : i32 to index
      %c0_143 = arith.constant 0 : index
      %c0_144 = arith.constant 0 : index
      %290 = vector.load %arg6[%289, %c0_143, %c0_144] : memref<14x16x128xf32, #tpu.memory_space<vmem>>, vector<1x16x128xf32>
      %291 = vector.shape_cast %290 : vector<1x16x128xf32> to vector<16x128xf32>
      %292 = vector.extract_strided_slice %46 {offsets = [45, 0], sizes = [1, 128], strides = [1, 1]} : vector<49x128xf32> to vector<1x128xf32>
      %293 = vector.broadcast %292 : vector<1x128xf32> to vector<16x128xf32>
      %294 = arith.mulf %291, %293 : vector<16x128xf32>
      %295 = arith.addf %283, %294 : vector<16x128xf32>
      %296 = vector.extract_strided_slice %46 {offsets = [46, 0], sizes = [1, 128], strides = [1, 1]} : vector<49x128xf32> to vector<1x128xf32>
      %297 = vector.broadcast %296 : vector<1x128xf32> to vector<16x128xf32>
      %298 = arith.mulf %291, %297 : vector<16x128xf32>
      %299 = arith.addf %287, %298 : vector<16x128xf32>
      %300 = arith.addf %213, %295 : vector<16x128xf32>
      %c15_i32 = arith.constant 15 : i32
      %301 = tpu.dynamic_rotate %299 by %c15_i32 dim 0 : vector<16x128xf32>, i32 -> vector<16x128xf32>
      %302 = arith.addf %300, %301 : vector<16x128xf32>
      %cst_145 = arith.constant 0.000000e+00 : f32
      %303 = vector.broadcast %cst_145 : f32 to vector<16x128xf32>
      %cst_146 = arith.constant 0.000000e+00 : f32
      %304 = vector.broadcast %cst_146 : f32 to vector<16x128xf32>
      %c0_i32_147 = arith.constant 0 : i32
      %305 = arith.addi %arg8, %c0_i32_147 : i32
      %306 = arith.index_cast %305 : i32 to index
      %c0_148 = arith.constant 0 : index
      %c0_149 = arith.constant 0 : index
      %307 = vector.load %arg6[%306, %c0_148, %c0_149] : memref<14x16x128xf32, #tpu.memory_space<vmem>>, vector<1x16x128xf32>
      %308 = vector.shape_cast %307 : vector<1x16x128xf32> to vector<16x128xf32>
      %309 = vector.extract_strided_slice %46 {offsets = [5, 0], sizes = [1, 128], strides = [1, 1]} : vector<49x128xf32> to vector<1x128xf32>
      %310 = vector.broadcast %309 : vector<1x128xf32> to vector<16x128xf32>
      %311 = arith.mulf %308, %310 : vector<16x128xf32>
      %312 = arith.addf %303, %311 : vector<16x128xf32>
      %313 = vector.extract_strided_slice %46 {offsets = [6, 0], sizes = [1, 128], strides = [1, 1]} : vector<49x128xf32> to vector<1x128xf32>
      %314 = vector.broadcast %313 : vector<1x128xf32> to vector<16x128xf32>
      %315 = arith.mulf %308, %314 : vector<16x128xf32>
      %316 = arith.addf %304, %315 : vector<16x128xf32>
      %c1_i32_150 = arith.constant 1 : i32
      %317 = arith.addi %arg8, %c1_i32_150 : i32
      %318 = arith.index_cast %317 : i32 to index
      %c0_151 = arith.constant 0 : index
      %c0_152 = arith.constant 0 : index
      %319 = vector.load %arg6[%318, %c0_151, %c0_152] : memref<14x16x128xf32, #tpu.memory_space<vmem>>, vector<1x16x128xf32>
      %320 = vector.shape_cast %319 : vector<1x16x128xf32> to vector<16x128xf32>
      %321 = vector.extract_strided_slice %46 {offsets = [12, 0], sizes = [1, 128], strides = [1, 1]} : vector<49x128xf32> to vector<1x128xf32>
      %322 = vector.broadcast %321 : vector<1x128xf32> to vector<16x128xf32>
      %323 = arith.mulf %320, %322 : vector<16x128xf32>
      %324 = arith.addf %312, %323 : vector<16x128xf32>
      %325 = vector.extract_strided_slice %46 {offsets = [13, 0], sizes = [1, 128], strides = [1, 1]} : vector<49x128xf32> to vector<1x128xf32>
      %326 = vector.broadcast %325 : vector<1x128xf32> to vector<16x128xf32>
      %327 = arith.mulf %320, %326 : vector<16x128xf32>
      %328 = arith.addf %316, %327 : vector<16x128xf32>
      %c2_i32_153 = arith.constant 2 : i32
      %329 = arith.addi %arg8, %c2_i32_153 : i32
      %330 = arith.index_cast %329 : i32 to index
      %c0_154 = arith.constant 0 : index
      %c0_155 = arith.constant 0 : index
      %331 = vector.load %arg6[%330, %c0_154, %c0_155] : memref<14x16x128xf32, #tpu.memory_space<vmem>>, vector<1x16x128xf32>
      %332 = vector.shape_cast %331 : vector<1x16x128xf32> to vector<16x128xf32>
      %333 = vector.extract_strided_slice %46 {offsets = [19, 0], sizes = [1, 128], strides = [1, 1]} : vector<49x128xf32> to vector<1x128xf32>
      %334 = vector.broadcast %333 : vector<1x128xf32> to vector<16x128xf32>
      %335 = arith.mulf %332, %334 : vector<16x128xf32>
      %336 = arith.addf %324, %335 : vector<16x128xf32>
      %337 = vector.extract_strided_slice %46 {offsets = [20, 0], sizes = [1, 128], strides = [1, 1]} : vector<49x128xf32> to vector<1x128xf32>
      %338 = vector.broadcast %337 : vector<1x128xf32> to vector<16x128xf32>
      %339 = arith.mulf %332, %338 : vector<16x128xf32>
      %340 = arith.addf %328, %339 : vector<16x128xf32>
      %c3_i32_156 = arith.constant 3 : i32
      %341 = arith.addi %arg8, %c3_i32_156 : i32
      %342 = arith.index_cast %341 : i32 to index
      %c0_157 = arith.constant 0 : index
      %c0_158 = arith.constant 0 : index
      %343 = vector.load %arg6[%342, %c0_157, %c0_158] : memref<14x16x128xf32, #tpu.memory_space<vmem>>, vector<1x16x128xf32>
      %344 = vector.shape_cast %343 : vector<1x16x128xf32> to vector<16x128xf32>
      %345 = vector.extract_strided_slice %46 {offsets = [26, 0], sizes = [1, 128], strides = [1, 1]} : vector<49x128xf32> to vector<1x128xf32>
      %346 = vector.broadcast %345 : vector<1x128xf32> to vector<16x128xf32>
      %347 = arith.mulf %344, %346 : vector<16x128xf32>
      %348 = arith.addf %336, %347 : vector<16x128xf32>
      %349 = vector.extract_strided_slice %46 {offsets = [27, 0], sizes = [1, 128], strides = [1, 1]} : vector<49x128xf32> to vector<1x128xf32>
      %350 = vector.broadcast %349 : vector<1x128xf32> to vector<16x128xf32>
      %351 = arith.mulf %344, %350 : vector<16x128xf32>
      %352 = arith.addf %340, %351 : vector<16x128xf32>
      %c4_i32_159 = arith.constant 4 : i32
      %353 = arith.addi %arg8, %c4_i32_159 : i32
      %354 = arith.index_cast %353 : i32 to index
      %c0_160 = arith.constant 0 : index
      %c0_161 = arith.constant 0 : index
      %355 = vector.load %arg6[%354, %c0_160, %c0_161] : memref<14x16x128xf32, #tpu.memory_space<vmem>>, vector<1x16x128xf32>
      %356 = vector.shape_cast %355 : vector<1x16x128xf32> to vector<16x128xf32>
      %357 = vector.extract_strided_slice %46 {offsets = [33, 0], sizes = [1, 128], strides = [1, 1]} : vector<49x128xf32> to vector<1x128xf32>
      %358 = vector.broadcast %357 : vector<1x128xf32> to vector<16x128xf32>
      %359 = arith.mulf %356, %358 : vector<16x128xf32>
      %360 = arith.addf %348, %359 : vector<16x128xf32>
      %361 = vector.extract_strided_slice %46 {offsets = [34, 0], sizes = [1, 128], strides = [1, 1]} : vector<49x128xf32> to vector<1x128xf32>
      %362 = vector.broadcast %361 : vector<1x128xf32> to vector<16x128xf32>
      %363 = arith.mulf %356, %362 : vector<16x128xf32>
      %364 = arith.addf %352, %363 : vector<16x128xf32>
      %c5_i32_162 = arith.constant 5 : i32
      %365 = arith.addi %arg8, %c5_i32_162 : i32
      %366 = arith.index_cast %365 : i32 to index
      %c0_163 = arith.constant 0 : index
      %c0_164 = arith.constant 0 : index
      %367 = vector.load %arg6[%366, %c0_163, %c0_164] : memref<14x16x128xf32, #tpu.memory_space<vmem>>, vector<1x16x128xf32>
      %368 = vector.shape_cast %367 : vector<1x16x128xf32> to vector<16x128xf32>
      %369 = vector.extract_strided_slice %46 {offsets = [40, 0], sizes = [1, 128], strides = [1, 1]} : vector<49x128xf32> to vector<1x128xf32>
      %370 = vector.broadcast %369 : vector<1x128xf32> to vector<16x128xf32>
      %371 = arith.mulf %368, %370 : vector<16x128xf32>
      %372 = arith.addf %360, %371 : vector<16x128xf32>
      %373 = vector.extract_strided_slice %46 {offsets = [41, 0], sizes = [1, 128], strides = [1, 1]} : vector<49x128xf32> to vector<1x128xf32>
      %374 = vector.broadcast %373 : vector<1x128xf32> to vector<16x128xf32>
      %375 = arith.mulf %368, %374 : vector<16x128xf32>
      %376 = arith.addf %364, %375 : vector<16x128xf32>
      %c6_i32_165 = arith.constant 6 : i32
      %377 = arith.addi %arg8, %c6_i32_165 : i32
      %378 = arith.index_cast %377 : i32 to index
      %c0_166 = arith.constant 0 : index
      %c0_167 = arith.constant 0 : index
      %379 = vector.load %arg6[%378, %c0_166, %c0_167] : memref<14x16x128xf32, #tpu.memory_space<vmem>>, vector<1x16x128xf32>
      %380 = vector.shape_cast %379 : vector<1x16x128xf32> to vector<16x128xf32>
      %381 = vector.extract_strided_slice %46 {offsets = [47, 0], sizes = [1, 128], strides = [1, 1]} : vector<49x128xf32> to vector<1x128xf32>
      %382 = vector.broadcast %381 : vector<1x128xf32> to vector<16x128xf32>
      %383 = arith.mulf %380, %382 : vector<16x128xf32>
      %384 = arith.addf %372, %383 : vector<16x128xf32>
      %385 = vector.extract_strided_slice %46 {offsets = [48, 0], sizes = [1, 128], strides = [1, 1]} : vector<49x128xf32> to vector<1x128xf32>
      %386 = vector.broadcast %385 : vector<1x128xf32> to vector<16x128xf32>
      %387 = arith.mulf %380, %386 : vector<16x128xf32>
      %388 = arith.addf %376, %387 : vector<16x128xf32>
      %c14_i32 = arith.constant 14 : i32
      %389 = tpu.dynamic_rotate %384 by %c14_i32 dim 0 : vector<16x128xf32>, i32 -> vector<16x128xf32>
      %390 = arith.addf %302, %389 : vector<16x128xf32>
      %c13_i32 = arith.constant 13 : i32
      %391 = tpu.dynamic_rotate %388 by %c13_i32 dim 0 : vector<16x128xf32>, i32 -> vector<16x128xf32>
      %392 = arith.addf %390, %391 : vector<16x128xf32>
      %393 = vector.broadcast %47 : vector<1x128xf32> to vector<16x128xf32>
      %394 = arith.addf %392, %393 : vector<16x128xf32>
      %395 = vector.extract_strided_slice %394 {offsets = [0, 0], sizes = [8, 128], strides = [1, 1]} : vector<16x128xf32> to vector<8x128xf32>
      %396 = arith.index_cast %arg8 : i32 to index
      %c0_168 = arith.constant 0 : index
      %c0_169 = arith.constant 0 : index
      %397 = vector.load %arg7[%396, %c0_168, %c0_169] : memref<8x8x128xf32, #tpu.memory_space<vmem>>, vector<1x8x128xf32>
      %398 = vector.shape_cast %397 : vector<1x8x128xf32> to vector<8x128xf32>
      %399 = vector.shape_cast %395 : vector<8x128xf32> to vector<1x8x128xf32>
      tpu.vector_store %arg7[%396, %c0_168, %c0_169], %399 {strides = array<i32>} : memref<8x8x128xf32, #tpu.memory_space<vmem>>, vector<1x8x128xf32>,
    }
    %c8_i32_46 = arith.constant 8 : i32
    %c0_47 = arith.constant 0 : index
    %c0_48 = arith.constant 0 : index
    %c0_49 = arith.constant 0 : index
    %49 = vector.load %arg2[%c0_47, %c0_48, %c0_49] : memref<1x65x128xf32, #tpu.memory_space<vmem>>, vector<1x1x128xf32>
    %50 = vector.shape_cast %49 : vector<1x1x128xf32> to vector<1x128xf32>
    %c0_50 = arith.constant 0 : index
    %c0_51 = arith.constant 0 : index
    %c0_52 = arith.constant 0 : index
    %51 = vector.load %arg5[%c0_50, %c0_51, %c0_52] : memref<1x65x128xf32, #tpu.memory_space<vmem>>, vector<1x1x128xf32>
    %52 = vector.shape_cast %51 : vector<1x1x128xf32> to vector<1x128xf32>
    %53 = vector.shape_cast %50 : vector<1x128xf32> to vector<1x1x128xf32>
    tpu.vector_store %arg5[%c0_50, %c0_51, %c0_52], %53 {strides = array<i32>} : memref<1x65x128xf32, #tpu.memory_space<vmem>>, vector<1x1x128xf32>,
    %c0_53 = arith.constant 0 : index
    %c0_54 = arith.constant 0 : index
    %c0_55 = arith.constant 0 : index
    %54 = vector.load %arg7[%c0_53, %c0_54, %c0_55] : memref<8x8x128xf32, #tpu.memory_space<vmem>>, vector<1x8x128xf32>
    %55 = vector.shape_cast %54 : vector<1x8x128xf32> to vector<8x128xf32>
    %c0_56 = arith.constant 0 : index
    %c1_57 = arith.constant 1 : index
    %c0_58 = arith.constant 0 : index
    %56 = vector.load %arg5[%c0_56, %c1_57, %c0_58] : memref<1x65x128xf32, #tpu.memory_space<vmem>>, vector<1x8x128xf32>
    %57 = vector.shape_cast %56 : vector<1x8x128xf32> to vector<8x128xf32>
    %58 = vector.shape_cast %55 : vector<8x128xf32> to vector<1x8x128xf32>
    tpu.vector_store %arg5[%c0_56, %c1_57, %c0_58], %58 {strides = array<i32>} : memref<1x65x128xf32, #tpu.memory_space<vmem>>, vector<1x8x128xf32>,
    %c1_59 = arith.constant 1 : index
    %c0_60 = arith.constant 0 : index
    %c0_61 = arith.constant 0 : index
    %59 = vector.load %arg7[%c1_59, %c0_60, %c0_61] : memref<8x8x128xf32, #tpu.memory_space<vmem>>, vector<1x8x128xf32>
    %60 = vector.shape_cast %59 : vector<1x8x128xf32> to vector<8x128xf32>
    %c0_62 = arith.constant 0 : index
    %c9_63 = arith.constant 9 : index
    %c0_64 = arith.constant 0 : index
    %61 = vector.load %arg5[%c0_62, %c9_63, %c0_64] : memref<1x65x128xf32, #tpu.memory_space<vmem>>, vector<1x8x128xf32>
    %62 = vector.shape_cast %61 : vector<1x8x128xf32> to vector<8x128xf32>
    %63 = vector.shape_cast %60 : vector<8x128xf32> to vector<1x8x128xf32>
    tpu.vector_store %arg5[%c0_62, %c9_63, %c0_64], %63 {strides = array<i32>} : memref<1x65x128xf32, #tpu.memory_space<vmem>>, vector<1x8x128xf32>,
    %c2 = arith.constant 2 : index
    %c0_65 = arith.constant 0 : index
    %c0_66 = arith.constant 0 : index
    %64 = vector.load %arg7[%c2, %c0_65, %c0_66] : memref<8x8x128xf32, #tpu.memory_space<vmem>>, vector<1x8x128xf32>
    %65 = vector.shape_cast %64 : vector<1x8x128xf32> to vector<8x128xf32>
    %c0_67 = arith.constant 0 : index
    %c17_68 = arith.constant 17 : index
    %c0_69 = arith.constant 0 : index
    %66 = vector.load %arg5[%c0_67, %c17_68, %c0_69] : memref<1x65x128xf32, #tpu.memory_space<vmem>>, vector<1x8x128xf32>
    %67 = vector.shape_cast %66 : vector<1x8x128xf32> to vector<8x128xf32>
    %68 = vector.shape_cast %65 : vector<8x128xf32> to vector<1x8x128xf32>
    tpu.vector_store %arg5[%c0_67, %c17_68, %c0_69], %68 {strides = array<i32>} : memref<1x65x128xf32, #tpu.memory_space<vmem>>, vector<1x8x128xf32>,
    %c3_70 = arith.constant 3 : index
    %c0_71 = arith.constant 0 : index
    %c0_72 = arith.constant 0 : index
    %69 = vector.load %arg7[%c3_70, %c0_71, %c0_72] : memref<8x8x128xf32, #tpu.memory_space<vmem>>, vector<1x8x128xf32>
    %70 = vector.shape_cast %69 : vector<1x8x128xf32> to vector<8x128xf32>
    %c0_73 = arith.constant 0 : index
    %c25_74 = arith.constant 25 : index
    %c0_75 = arith.constant 0 : index
    %71 = vector.load %arg5[%c0_73, %c25_74, %c0_75] : memref<1x65x128xf32, #tpu.memory_space<vmem>>, vector<1x8x128xf32>
    %72 = vector.shape_cast %71 : vector<1x8x128xf32> to vector<8x128xf32>
    %73 = vector.shape_cast %70 : vector<8x128xf32> to vector<1x8x128xf32>
    tpu.vector_store %arg5[%c0_73, %c25_74, %c0_75], %73 {strides = array<i32>} : memref<1x65x128xf32, #tpu.memory_space<vmem>>, vector<1x8x128xf32>,
    %c4_76 = arith.constant 4 : index
    %c0_77 = arith.constant 0 : index
    %c0_78 = arith.constant 0 : index
    %74 = vector.load %arg7[%c4_76, %c0_77, %c0_78] : memref<8x8x128xf32, #tpu.memory_space<vmem>>, vector<1x8x128xf32>
    %75 = vector.shape_cast %74 : vector<1x8x128xf32> to vector<8x128xf32>
    %c0_79 = arith.constant 0 : index
    %c33_80 = arith.constant 33 : index
    %c0_81 = arith.constant 0 : index
    %76 = vector.load %arg5[%c0_79, %c33_80, %c0_81] : memref<1x65x128xf32, #tpu.memory_space<vmem>>, vector<1x8x128xf32>
    %77 = vector.shape_cast %76 : vector<1x8x128xf32> to vector<8x128xf32>
    %78 = vector.shape_cast %75 : vector<8x128xf32> to vector<1x8x128xf32>
    tpu.vector_store %arg5[%c0_79, %c33_80, %c0_81], %78 {strides = array<i32>} : memref<1x65x128xf32, #tpu.memory_space<vmem>>, vector<1x8x128xf32>,
    %c5_82 = arith.constant 5 : index
    %c0_83 = arith.constant 0 : index
    %c0_84 = arith.constant 0 : index
    %79 = vector.load %arg7[%c5_82, %c0_83, %c0_84] : memref<8x8x128xf32, #tpu.memory_space<vmem>>, vector<1x8x128xf32>
    %80 = vector.shape_cast %79 : vector<1x8x128xf32> to vector<8x128xf32>
    %c0_85 = arith.constant 0 : index
    %c41_86 = arith.constant 41 : index
    %c0_87 = arith.constant 0 : index
    %81 = vector.load %arg5[%c0_85, %c41_86, %c0_87] : memref<1x65x128xf32, #tpu.memory_space<vmem>>, vector<1x8x128xf32>
    %82 = vector.shape_cast %81 : vector<1x8x128xf32> to vector<8x128xf32>
    %83 = vector.shape_cast %80 : vector<8x128xf32> to vector<1x8x128xf32>
    tpu.vector_store %arg5[%c0_85, %c41_86, %c0_87], %83 {strides = array<i32>} : memref<1x65x128xf32, #tpu.memory_space<vmem>>, vector<1x8x128xf32>,
    %c6_88 = arith.constant 6 : index
    %c0_89 = arith.constant 0 : index
    %c0_90 = arith.constant 0 : index
    %84 = vector.load %arg7[%c6_88, %c0_89, %c0_90] : memref<8x8x128xf32, #tpu.memory_space<vmem>>, vector<1x8x128xf32>
    %85 = vector.shape_cast %84 : vector<1x8x128xf32> to vector<8x128xf32>
    %c0_91 = arith.constant 0 : index
    %c49_92 = arith.constant 49 : index
    %c0_93 = arith.constant 0 : index
    %86 = vector.load %arg5[%c0_91, %c49_92, %c0_93] : memref<1x65x128xf32, #tpu.memory_space<vmem>>, vector<1x8x128xf32>
    %87 = vector.shape_cast %86 : vector<1x8x128xf32> to vector<8x128xf32>
    %88 = vector.shape_cast %85 : vector<8x128xf32> to vector<1x8x128xf32>
    tpu.vector_store %arg5[%c0_91, %c49_92, %c0_93], %88 {strides = array<i32>} : memref<1x65x128xf32, #tpu.memory_space<vmem>>, vector<1x8x128xf32>,
    %c7_94 = arith.constant 7 : index
    %c0_95 = arith.constant 0 : index
    %c0_96 = arith.constant 0 : index
    %89 = vector.load %arg7[%c7_94, %c0_95, %c0_96] : memref<8x8x128xf32, #tpu.memory_space<vmem>>, vector<1x8x128xf32>
    %90 = vector.shape_cast %89 : vector<1x8x128xf32> to vector<8x128xf32>
    %c0_97 = arith.constant 0 : index
    %c57_98 = arith.constant 57 : index
    %c0_99 = arith.constant 0 : index
    %91 = vector.load %arg5[%c0_97, %c57_98, %c0_99] : memref<1x65x128xf32, #tpu.memory_space<vmem>>, vector<1x8x128xf32>
    %92 = vector.shape_cast %91 : vector<1x8x128xf32> to vector<8x128xf32>
    %93 = vector.shape_cast %90 : vector<8x128xf32> to vector<1x8x128xf32>
    tpu.vector_store %arg5[%c0_97, %c57_98, %c0_99], %93 {strides = array<i32>} : memref<1x65x128xf32, #tpu.memory_space<vmem>>, vector<1x8x128xf32>,
    return
  }
  func.func @transform_0(%arg0: i32, %arg1: i32) -> (i32, i32, i32) {
    %c0_i32 = arith.constant 0 : i32
    %c0_i32_0 = arith.constant 0 : i32
    return %arg1, %c0_i32, %arg0 : i32, i32, i32
  }
  func.func @transform_1(%arg0: i32, %arg1: i32) -> (i32, i32) {
    %c0_i32 = arith.constant 0 : i32
    %c0_i32_0 = arith.constant 0 : i32
    return %c0_i32, %arg0 : i32, i32
  }
  func.func @transform_2(%arg0: i32, %arg1: i32) -> (i32, i32) {
    %c0_i32 = arith.constant 0 : i32
    %c0_i32_0 = arith.constant 0 : i32
    return %c0_i32, %arg0 : i32, i32
  }
  func.func @transform_3(%arg0: i32, %arg1: i32) -> (i32, i32, i32) {
    %c0_i32 = arith.constant 0 : i32
    %c0_i32_0 = arith.constant 0 : i32
    return %arg1, %c0_i32, %arg0 : i32, i32, i32
  }
}

</mosaic_0001>

<bundles_post_ra>
// kernel: tpu_custom_call.1
= control target key start
LH: loop header
LB: loop body
LE: loop exit
PB: predicated region body
PF: predicated region fallthrough
CT: control target
= control target key end

     0   :  { %s1303_s12 = smov 0   ;;  %s1305_s13 = smov 0   ;;  %s1783_s0 = inlined_call_operand.vmem [shape: f32[2,65,256], index: 0, kind: input, shape index: {}]   ;;  %s1784_s1 = inlined_call_operand.vmem [shape: f32[49,256], index: 1, kind: input, shape index: {}]   ;;  %s1785_s2 = inlined_call_operand.vmem [shape: f32[1,256], index: 2, kind: input, shape index: {}]   ;;  %s1786_s3 = inlined_call_operand.vmem [shape: f32[2,65,256], index: 3, kind: output, shape index: {}]  }
   0x1   :  { %s1307_s14 = smov 0   ;;  %s1309_s15 = smov 0  }
   0x2   :  { %s1311_s16 = smov 0   ;;  %s1313_s17 = smov 0  }
   0x3   :  { %s1315_s18 = smov 0   ;;  %s1317_s19 = smov 0  }
   0x4   :  { %s1319_s20 = smov 0  }
   0x5 LB: > { %s22_s21 = sadd.s32 1, %s1268_s18  ;;  %s25_s22 = sadd.s32 1, %s1272_s19  ;;  %s1276_s20 = sphi %s1319_s20, %s13_s20   ;;  %s1272_s19 = sphi %s1317_s19, %s1797_s19   ;;  %s1268_s18 = sphi %s1315_s18, %s1796_s18   ;;  %s1264_s17 = sphi %s1313_s17, %s1795_s17   ;;  %s1260_s16 = sphi %s1311_s16, %s1794_s16   ;;  %s1256_s15 = sphi %s1309_s15, %s1793_s15   ;;  %s1252_s14 = sphi %s1307_s14, %s1792_s14   ;;  %s1248_s13 = sphi %s1305_s13, %s1791_s13   ;;  %s1244_s12 = sphi %s1303_s12, %s1790_s12  }
   0x6   : > { %p23_p0 = scmp.ge.s32.totalorder %s22_s21, 2  ;;  %s1083_s23 = sadd.s32 4294967295, %s1276_s20  }
   0x7   : > { %p41_p1 = scmp.ne.s32.totalorder %s1256_s15, %s1252_s14  ;;  %s34_s24 = sadd.s32 1, %s1256_s15 }
   0x8   : > { %s1799_s21 = smov (%p23_p0, %s22_s21), 0  ;;  %s1801_s22 = smov (!%p23_p0, %s25_s22), %s1272_s19 }
   0x9   : > { %p42_p2 = scmp.eq.s32.totalorder %s1276_s20, 0  ;;  %p27_p3 = scmp.ge.s32.totalorder %s1801_s22, 2 }
   0xa   : > { %s29_s25 = ssub.s32 %s1268_s18, %s1799_s21  ;;  %p67_p5 = scmp.ne.s32.totalorder %s1248_s13, %s1244_s12 }
   0xb   : > { %p1363_p4 = por %p42_p2, %p41_p1  ;;  %s1803_s22 = smov (%p27_p3, %s1801_s22), 0 }
   0xc   : > { %p1371_p6 = por %p67_p5, %p42_p2  ;;  %p125_p7 = scmp.eq.s32.totalorder %s1083_s23, 3 }
   0xd   : > { %s30_s28 = ssub.s32 %s1272_s19, %s1803_s22  ;;  %s60_s29 = sadd.s32 1, %s1248_s13 }
   0xe   : > { %s31_s30 = sor.u32 %s30_s28, %s29_s25  ;;  %p58_p8 = scmp.eq.s32.totalorder %s30_s28, 0 }
   0xf   : > { %p32_p9 = scmp.eq.s32.totalorder %s31_s30, 0  ;;  %p1381_p10 = por %p125_p7, %p41_p1 }
  0x10   : > { %s1386_s5 = scalar_select %p58_p8, %s1248_s13, %s60_s29  }
  0x11   : > { %s1389_s6 = scalar_select %p32_p9, %s1256_s15, %s34_s24  }
  0x12   : > { %p1086_p11 = scmp.ge.s32.totalorder %s1276_s20, 4 }
  0x14   : > { %147 = sbr.rel (%p1086_p11) target bundleno = 45 (0x2d), region = 16 }
  0x19   : > { %150 = sbr.rel (!%p1363_p4) target bundleno = 37 (0x25), region = 20  ;;  %s152_s7 = sand.u32 (%p1363_p4), 1, %s1256_s15  }
  0x1a   : > { %s1116_s8 = smul.u32 (%p1363_p4), 18, %s1268_s18 }
  0x1b   : > { %s1115_s9 = smul.u32 (%p1363_p4), 72, %s152_s7 }
  0x1c   : > { %s156_s10 = sadd.s32 (%p1363_p4), %s1272_s19, %s1116_s8 }
  0x1d   : > { %s1087_s11 = sshll.u32 (%p1363_p4), %s156_s10, 3  ;;  %s154_s24 = scalar_lea.vmem (%p1363_p4), [#allocation4], %s1115_s9 }
  0x1e   : > { %s158_s28 = scalar_lea.vmem %s1783_s0, %s1087_s11 }
  0x1f   : > { %v203_v0 = vld [vmem:[%s158_s28] sm:$0xff]  ;;  %v205_v1 = vld [vmem:[%s158_s28 + $0x10] sm:$0xff] }
  0x20   : > { %v207_v2 = vld [vmem:[%s158_s28 + $0x20] sm:$0xff]  ;;  %204 = vst [vmem:[%s154_s24] sm:$0xff] %v203_v0  ;;  %206 = vst [vmem:[%s154_s24 + $0x8] sm:$0xff] %v205_v1  ;;  %v209_v3 = vld [vmem:[%s158_s28 + $0x30] sm:$0xff] }
  0x21   : > { %208 = vst [vmem:[%s154_s24 + $0x10] sm:$0xff] %v207_v2  ;;  %v211_v4 = vld [vmem:[%s158_s28 + $0x40] sm:$0xff]  ;;  %v213_v5 = vld [vmem:[%s158_s28 + $0x50] sm:$0xff]  ;;  %210 = vst [vmem:[%s154_s24 + $0x18] sm:$0xff] %v209_v3 }
  0x22   : > { %212 = vst [vmem:[%s154_s24 + $0x20] sm:$0xff] %v211_v4  ;;  %214 = vst [vmem:[%s154_s24 + $0x28] sm:$0xff] %v213_v5  ;;  %v215_v6 = vld [vmem:[%s158_s28 + $0x60] sm:$0xff]  ;;  %v217_v7 = vld [vmem:[%s158_s28 + $0x70] sm:$0xff] }
  0x23   : > { %v219_v8 = vld [vmem:[%s158_s28 + $0x80] sm:$0xff]  ;;  %216 = vst [vmem:[%s154_s24 + $0x30] sm:$0xff] %v215_v6  ;;  %218 = vst [vmem:[%s154_s24 + $0x38] sm:$0xff] %v217_v7 }
  0x24   : > { %220 = vst [vmem:[%s154_s24 + $0x40] sm:$0xff] %v219_v8 }
  0x25 PF: > { %226 = sbr.rel (!%p1371_p6) target bundleno = 45 (0x2d), region = 58  ;;  %s228_s26 = sand.u32 (%p1371_p6), 1, %s1248_s13  }
  0x26   : > { %s1088_s29 = sshll.u32 (%p1371_p6), %s1272_s19, 3  ;;  %s1117_s30 = smul.u32 (%p1371_p6), 56, %s228_s26 }
  0x27   : > { %s232_s9 = scalar_lea.vmem (%p1371_p6), %s1784_s1, %s1088_s29 }
  0x28   : > { %v273_v9 = vld [vmem:[%s232_s9] sm:$0xff] (%p1371_p6)  ;;  %v275_v10 = vld [vmem:[%s232_s9 + $0x10] sm:$0xff] (%p1371_p6)  ;;  %s230_s10 = scalar_lea.vmem (%p1371_p6), [#allocation5], %s1117_s30 }
  0x29   : > { %v277_v11 = vld [vmem:[%s232_s9 + $0x20] sm:$0xff] (%p1371_p6)  ;;  %v279_v12 = vld [vmem:[%s232_s9 + $0x30] sm:$0xff] (%p1371_p6)  ;;  %274 = vst [vmem:[%s230_s10] sm:$0xff] (%p1371_p6), %v273_v9  ;;  %276 = vst [vmem:[%s230_s10 + $0x8] sm:$0xff] (%p1371_p6), %v275_v10 }
  0x2a   : > { %v281_v13 = vld [vmem:[%s232_s9 + $0x40] sm:$0xff]  ;;  %v283_v14 = vld [vmem:[%s232_s9 + $0x50] sm:$0xff]  ;;  %278 = vst [vmem:[%s230_s10 + $0x10] sm:$0xff] %v277_v11  ;;  %280 = vst [vmem:[%s230_s10 + $0x18] sm:$0xff] %v279_v12 }
  0x2b   : > { %282 = vst [vmem:[%s230_s10 + $0x20] sm:$0xff] %v281_v13  ;;  %284 = vst [vmem:[%s230_s10 + $0x28] sm:$0xff] %v283_v14  ;;  %v285_v15 = vld [vmem:[%s232_s9 + $0x60] sm:$0xff] }
  0x2c   : > { %286 = vst [vmem:[%s230_s10 + $0x30] sm:$0xff] %v285_v15 }
  0x2d PF: > { %p1089_p12 = scmp.ge.s32.totalorder %s1276_s20, 1  ;;  %p297_p13 = scmp.lt.s32.totalorder %s1276_s20, 5 }
  0x2f   : > { %p298_p0 = pnand %p1089_p12, %p297_p13 }
  0x30   : > { %s311_s27 = sand.u32 (!%p298_p0), 1, %s1244_s12   ;;  %p340_p1 = scmp.lt.s32.totalorder (!%p298_p0), %s1264_s17, 1 }
  0x31   : > { %301 = sbr.rel (%p298_p0) target bundleno = 166 (0xa6), region = 100  ;;  %s304_s12 = sand.u32 (!%p298_p0), 1, %s1252_s14  }
  0x32   : > { %s1119_s11 = smul.u32 (!%p298_p0), 56, %s311_s27  ;;  %s1446_s7 = smov (!%p298_p0), 0  }
  0x33   : > { %s1118_s25 = smul.u32 (!%p298_p0), 72, %s304_s12 }
  0x34   : > { %s313_s29 = scalar_lea.vmem (!%p298_p0), [#allocation5], %s1119_s11 }
  0x35   : > { %s1434_s14 = scalar_lea.vmem (!%p298_p0), [#allocation4], %s1118_s25  ;;  %s1444_s30 = scalar_lea.vmem (!%p298_p0), [#allocation6], %s1118_s25 }
  0x36   : > { %v1282_v16 = vmov 0.0   ;;  %s341_s23 = scalar_select %p340_p1, %s1264_s17, 1  ;;  %v1418_v17 = vld [vmem:[%s313_s29] sm:$0xff]  ;;  %v1420_v18 = vld [vmem:[%s313_s29 + $0x8] sm:$0xff]  ;;  %v1422_v19 = vld [vmem:[%s313_s29 + $0x10] sm:$0xff] }
  0x37   : > { %343 = vst [vmem:[#allocation2] sm:$0xff] %v1282_v16  ;;  %344 = vst [vmem:[#allocation2 + $0x8] sm:$0xff] %v1282_v16  ;;  %v1424_v20 = vld [vmem:[%s313_s29 + $0x18] sm:$0xff]  ;;  %v1426_v21 = vld [vmem:[%s313_s29 + $0x20] sm:$0xff] }
  0x38   : > { %345 = vst [vmem:[#allocation2 + $0x10] sm:$0xff] %v1282_v16  ;;  %346 = vst [vmem:[#allocation2 + $0x18] sm:$0xff] %v1282_v16  ;;  %s342_s26 = scalar_lea.vmem %s1785_s2, %s341_s23  ;;  %v1428_v22 = vld [vmem:[%s313_s29 + $0x28] sm:$0xff]  ;;  %v1430_v23 = vld [vmem:[%s313_s29 + $0x30] ss:$0 sm:$0xff] }
  0x39   : > { %347 = vst [vmem:[#allocation2 + $0x20] sm:$0xff] %v1282_v16  ;;  %348 = vst [vmem:[#allocation2 + $0x28] sm:$0xff] %v1282_v16  ;;  %v1432_v24 = vld [vmem:[%s342_s26] ss:$0 sm:$0xff]  ;;  %v365_v25 = vld [vmem:[%s1434_s14 + $0x1] sm:$0xff] }
  0x3a   : > { %350 = vst [vmem:[#allocation2 + $0xb0] sm:$0xff] %v1282_v16  ;;  %351 = vst [vmem:[#allocation2 + $0xb8] sm:$0xff] %v1282_v16  ;;  %v367_v26 = vld [vmem:[%s1434_s14 + $0x9] sm:$0xff]  ;;  %v370_v27 = vld [vmem:[%s1434_s14 + $0x11] sm:$0xff] }
  0x3b   : > { %352 = vst [vmem:[#allocation2 + $0xc0] sm:$0xff] %v1282_v16  ;;  %353 = vst [vmem:[#allocation2 + $0xc8] sm:$0xff] %v1282_v16  ;;  %v373_v28 = vld [vmem:[%s1434_s14 + $0x19] sm:$0xff]  ;;  %v376_v29 = vld [vmem:[%s1434_s14 + $0x21] sm:$0xff] }
  0x3c   : > { %354 = vst [vmem:[#allocation2 + $0xd0] sm:$0xff] %v1282_v16  ;;  %355 = vst [vmem:[#allocation2 + $0xd8] sm:$0xff] %v1282_v16  ;;  %v379_v30 = vld [vmem:[%s1434_s14 + $0x29] sm:$0xff]  ;;  %v382_v31 = vld [vmem:[%s1434_s14 + $0x31] sm:$0xff] }
  0x3d   : > { %357 = vst [vmem:[#allocation2 + $0x38] sm:$0xff] %v1282_v16  ;;  %358 = vst [vmem:[#allocation2 + $0x48] sm:$0xff] %v1282_v16  ;;  %v385_v32 = vld [vmem:[%s1434_s14 + $0x39] sm:$0xff] }
  0x3e   : > { %359 = vst [vmem:[#allocation2 + $0x58] sm:$0xff] %v1282_v16  ;;  %360 = vst [vmem:[#allocation2 + $0x68] sm:$0xff] %v1282_v16 }
  0x3f   : > { %361 = vst [vmem:[#allocation2 + $0x78] sm:$0xff] %v1282_v16  ;;  %362 = vst [vmem:[#allocation2 + $0x88] sm:$0xff] %v1282_v16 }
  0x40   : > { %363 = vst [vmem:[#allocation2 + $0x98] sm:$0xff] %v1282_v16  ;;  %364 = vst [vmem:[#allocation2 + $0xa8] sm:$0xff] %v1282_v16 }
  0x41   : > { %366 = vst [vmem:[#allocation2 + $0x30] sm:$0xff] %v365_v25  ;;  %369 = vst [vmem:[#allocation2 + $0x40] sm:$0xff] %v367_v26 }
  0x42   : > { %372 = vst [vmem:[#allocation2 + $0x50] sm:$0xff] %v370_v27  ;;  %375 = vst [vmem:[#allocation2 + $0x60] sm:$0xff] %v373_v28 }
  0x43   : > { %378 = vst [vmem:[#allocation2 + $0x70] sm:$0xff] %v376_v29  ;;  %381 = vst [vmem:[#allocation2 + $0x80] sm:$0xff] %v379_v30 }
  0x44   : > { %384 = vst [vmem:[#allocation2 + $0x90] sm:$0xff] %v382_v31  ;;  %387 = vst [vmem:[#allocation2 + $0xa0] sm:$0xff] %v385_v32 }
  0x45 LB: >> { %v406_v33 = vlaneseq  ;;  %s1090_s8 = sshll.u32 %s1280_s7, 4  ;;  %s1111_s10 = sshll.u32 %s1280_s7, 3  ;;  %s1280_s7 = sphi %s1446_s7, %s401_s7  }
  0x46   : >> { %s1463_s9 = scalar_lea.vmem [#allocation2], %s1090_s8  ;;  %s854_s27 = scalar_lea.vmem [#allocation3], %s1111_s10 }
  0x47   : >> { %v1452_v34 = vshrl.u32 %v406_v33, 7  ;;  %s401_s7 = sadd.s32 1, %s1280_s7  }
  0x48   : >> { %p398_p2 = scmp.ge.s32.totalorder %s401_s7, 8  }
  0x49   : >> { %v1455_v35 = vsub.s32 0, %v1452_v34  ;;  %v1458_v36 = vsub.s32 1, %v1452_v34  ;;  %v1461_v37 = vsub.s32 2, %v1452_v34  ;;  %v1472_v40 = vsub.s32 7, %v1452_v34 }
  0x4a   : >> { %v1475_v41 = vsub.s32 6, %v1452_v34  ;;  %v1478_v42 = vsub.s32 5, %v1452_v34  ;;  %v1539_v31 = vsub.s32 4, %v1452_v34  ;;  %vm608_vm0 = vcmp.lt.s32.totalorder %v1452_v34, 3 }
  0x4b   : >> { %v1466_v38 = vld [vmem:[%s1463_s9] sm:$0xff]  ;;  %v1469_v39 = vld [vmem:[%s1463_s9 + $0x8] sm:$0xff]  ;;  %v409_v43 = vrot.slane %v1418_v17, %v1455_v35  ;;  %v417_v44 = vrot.slane %v1418_v17, %v1458_v36  ;;  %v425_v45 = vrot.slane %v1418_v17, %v1461_v37  ;;  %v1487_v46 = vld [vmem:[%s1463_s9 + $0x10] sm:$0xff]  ;;  %v446_v48 = vrot.slane %v1420_v18, %v1455_v35 }
  0x4c   : >> { %v1490_v47 = vld [vmem:[%s1463_s9 + $0x18] sm:$0xff]  ;;  %v438_v49 = vrot.slane %v1418_v17, %v1472_v40  ;;  %v454_v50 = vrot.slane %v1420_v18, %v1458_v36  ;;  %v467_v51 = vrot.slane %v1420_v18, %v1475_v41  ;;  %v475_v52 = vrot.slane %v1420_v18, %v1472_v40  ;;  %v1507_v57 = vld [vmem:[%s1463_s9 + $0x20] sm:$0xff]  ;;  %v1510_v58 = vld [vmem:[%s1463_s9 + $0x28] sm:$0xff] }
  0x4d   : >> { %v410_v53 = vmul.f32 %v409_v43, %v1466_v38  ;;  %v411_v54 = vmul.f32 %v409_v43, %v1469_v39  ;;  %v418_v55 = vmul.f32 %v417_v44, %v1466_v38  ;;  %v419_v56 = vmul.f32 %v417_v44, %v1469_v39  ;;  %v1525_v15 = vld [vmem:[%s1463_s9 + $0x30] sm:$0xff]  ;;  %v1528_v16 = vld [vmem:[%s1463_s9 + $0x38] sm:$0xff] }
  0x4e   : >> { %v426_v59 = vmul.f32 %v425_v45, %v1466_v38  ;;  %v427_v60 = vmul.f32 %v425_v45, %v1469_v39  ;;  %v439_v61 = vmul.f32 %v1487_v46, %v438_v49  ;;  %v440_v62 = vmul.f32 %v1490_v47, %v438_v49 }
  0x4f   : >> { %v447_v63 = vmul.f32 %v1487_v46, %v446_v48  ;;  %v448_v0 = vmul.f32 %v1490_v47, %v446_v48  ;;  %v455_v1 = vmul.f32 %v1487_v46, %v454_v50  ;;  %v456_v2 = vmul.f32 %v1490_v47, %v454_v50  ;;  %v1548_v48 = vld [vmem:[%s1463_s9 + $0x40] sm:$0xff] }
  0x50   : >> { %v441_v3 = vadd.f32 %v439_v61, %v410_v53  ;;  %v442_v4 = vadd.f32 %v440_v62, %v411_v54  ;;  %v468_v5 = vmul.f32 %v1507_v57, %v467_v51  ;;  %v469_v6 = vmul.f32 %v1510_v58, %v467_v51  ;;  %v1555_v53 = vld [vmem:[%s1463_s9 + $0x48] sm:$0xff] }
  0x51   : >> { %v449_v7 = vadd.f32 %v447_v63, %v418_v55  ;;  %v450_v8 = vadd.f32 %v448_v0, %v419_v56  ;;  %v457_v9 = vadd.f32 %v455_v1, %v426_v59  ;;  %v458_v10 = vadd.f32 %v456_v2, %v427_v60 }
  0x52   : >> { %v470_v11 = vadd.f32 %v468_v5, %v441_v3  ;;  %v471_v12 = vadd.f32 %v469_v6, %v442_v4  ;;  %v476_v13 = vmul.f32 %v1507_v57, %v475_v52  ;;  %v477_v14 = vmul.f32 %v1510_v58, %v475_v52 }
  0x53   : >> { %v483_v25 = vrot.slane %v1422_v19, %v1455_v35  ;;  %v496_v26 = vrot.slane %v1422_v19, %v1478_v42  ;;  %v504_v27 = vrot.slane %v1422_v19, %v1475_v41  ;;  %v512_v28 = vrot.slane %v1422_v19, %v1472_v40 }
  0x54   : >> { %v478_v29 = vadd.f32 %v476_v13, %v449_v7  ;;  %v479_v30 = vadd.f32 %v477_v14, %v450_v8  ;;  %v533_v32 = vrot.slane %v1424_v20, %v1478_v42  ;;  %v525_v62 = vrot.slane %v1424_v20, %v1539_v31  ;;  %v1566_v7 = vld [vmem:[%s1463_s9 + $0x50] sm:$0xff]  ;;  %v1569_v8 = vld [vmem:[%s1463_s9 + $0x58] sm:$0xff] }
  0x55   : >> { %v484_v33 = vmul.f32 %v1507_v57, %v483_v25  ;;  %v485_v43 = vmul.f32 %v1510_v58, %v483_v25  ;;  %v497_v44 = vmul.f32 %v1525_v15, %v496_v26  ;;  %v498_v45 = vmul.f32 %v1528_v16, %v496_v26 }
  0x56   : >> { %v505_v49 = vmul.f32 %v1525_v15, %v504_v27  ;;  %v506_v50 = vmul.f32 %v1528_v16, %v504_v27  ;;  %v513_v51 = vmul.f32 %v1525_v15, %v512_v28  ;;  %v514_v52 = vmul.f32 %v1528_v16, %v512_v28 }
  0x57   : >> { %v486_v54 = vadd.f32 %v484_v33, %v457_v9  ;;  %v487_v55 = vadd.f32 %v485_v43, %v458_v10  ;;  %v499_v56 = vadd.f32 %v497_v44, %v470_v11  ;;  %v500_v59 = vadd.f32 %v498_v45, %v471_v12 }
  0x58   : >> { %v507_v60 = vadd.f32 %v505_v49, %v478_v29  ;;  %v508_v61 = vadd.f32 %v506_v50, %v479_v30  ;;  %v534_v63 = vmul.f32 %v1548_v48, %v533_v32  ;;  %v535_v2 = vmul.f32 %v1555_v53, %v533_v32  ;;  %v1589_v49 = vld [vmem:[%s1463_s9 + $0x60] sm:$0xff]  ;;  %v1592_v50 = vld [vmem:[%s1463_s9 + $0x68] sm:$0xff] }
  0x59   : >> { %v515_v0 = vadd.f32 %v513_v51, %v486_v54  ;;  %v516_v1 = vadd.f32 %v514_v52, %v487_v55  ;;  %v541_v3 = vrot.slane %v1424_v20, %v1475_v41  ;;  %v526_v4 = vmul.f32 %v1548_v48, %v525_v62 }
  0x5a   : >> { %v527_v5 = vmul.f32 %v1555_v53, %v525_v62  ;;  %v536_v6 = vadd.f32 %v534_v63, %v507_v60  ;;  %v1572_v9 = vsub.s32 3, %v1452_v34  ;;  %v537_v10 = vadd.f32 %v535_v2, %v508_v61 }
  0x5b   : >> { %v542_v11 = vmul.f32 %v1548_v48, %v541_v3  ;;  %v543_v12 = vmul.f32 %v1555_v53, %v541_v3  ;;  %v562_v13 = vrot.slane %v1426_v21, %v1539_v31  ;;  %v528_v14 = vadd.f32 %v526_v4, %v499_v56 }
  0x5c   : >> { %v529_v25 = vadd.f32 %v527_v5, %v500_v59  ;;  %v554_v26 = vrot.slane %v1426_v21, %v1572_v9  ;;  %v570_v27 = vrot.slane %v1426_v21, %v1478_v42  ;;  %v583_v54 = vrot.slane %v1428_v22, %v1461_v37 }
  0x5d   : >> { %v544_v28 = vadd.f32 %v542_v11, %v515_v0  ;;  %v545_v29 = vadd.f32 %v543_v12, %v516_v1  ;;  %v563_v30 = vmul.f32 %v1566_v7, %v562_v13  ;;  %v564_v32 = vmul.f32 %v1569_v8, %v562_v13 }
  0x5e   : >> { %v555_v33 = vmul.f32 %v1566_v7, %v554_v26  ;;  %v556_v43 = vmul.f32 %v1569_v8, %v554_v26  ;;  %v571_v44 = vmul.f32 %v1566_v7, %v570_v27  ;;  %v572_v45 = vmul.f32 %v1569_v8, %v570_v27 }
  0x5f   : >> { %v565_v51 = vadd.f32 %v563_v30, %v536_v6  ;;  %v566_v52 = vadd.f32 %v564_v32, %v537_v10  ;;  %v591_v55 = vrot.slane %v1428_v22, %v1572_v9  ;;  %v584_v61 = vmul.f32 %v1589_v49, %v583_v54 }
  0x60   : >> { %v557_v56 = vadd.f32 %v555_v33, %v528_v14  ;;  %v558_v59 = vadd.f32 %v556_v43, %v529_v25  ;;  %v573_v60 = vadd.f32 %v571_v44, %v544_v28  ;;  %v585_v62 = vmul.f32 %v1592_v50, %v583_v54 }
  0x61   : >> { %v592_v63 = vmul.f32 %v1589_v49, %v591_v55  ;;  %v593_v0 = vmul.f32 %v1592_v50, %v591_v55  ;;  %v574_v1 = vadd.f32 %v572_v45, %v545_v29  ;;  %v599_v2 = vrot.slane %v1428_v22, %v1539_v31 }
  0x62   : >> { %vm612_vm1 = vcmp.lt.s32.totalorder %v1452_v34, 2  ;;  %v586_v3 = vadd.f32 %v584_v61, %v557_v56  ;;  %v587_v4 = vadd.f32 %v585_v62, %v558_v59  ;;  %v623_v12 = vrot.slane %v1418_v17, %v1572_v9 }
  0x63   : >> { %v594_v5 = vadd.f32 %v592_v63, %v565_v51  ;;  %v595_v6 = vadd.f32 %v593_v0, %v566_v52  ;;  %v600_v10 = vmul.f32 %v1589_v49, %v599_v2  ;;  %v601_v11 = vmul.f32 %v1592_v50, %v599_v2 }
  0x64   : >> { %v629_v13 = vrot.slane %v1418_v17, %v1539_v31  ;;  %v604_v14 = vrot.slane %v586_v3, 5  ;;  %v605_v25 = vrot.slane %v587_v4, 5  ;;  %vm617_vm2 = vcmp.lt.s32.totalorder %v1452_v34, 1 }
  0x65   : >> { %v610_v26 = vrot.slane %v594_v5, 6  ;;  %v611_v27 = vrot.slane %v595_v6, 6  ;;  %v602_v28 = vadd.f32 %v600_v10, %v573_v60  ;;  %v603_v29 = vadd.f32 %v601_v11, %v574_v1 }
  0x66   : >> { %v624_v30 = vmul.f32 %v623_v12, %v1466_v38  ;;  %v609_v32 = vsel %vm608_vm0, %v605_v25, %v604_v14  ;;  %v630_v43 = vmul.f32 %v629_v13, %v1466_v38  ;;  %v637_v44 = vrot.slane %v1420_v18, %v1461_v37 }
  0x67   : >> { %v613_v33 = vsel %vm612_vm1, %v611_v27, %v610_v26  ;;  %v615_v45 = vrot.slane %v602_v28, 7  ;;  %v616_v51 = vrot.slane %v603_v29, 7  ;;  %v631_v52 = vmul.f32 %v629_v13, %v1469_v39 }
  0x68   : >> { %v643_v54 = vrot.slane %v1420_v18, %v1572_v9  ;;  %v638_v55 = vmul.f32 %v1487_v46, %v637_v44  ;;  %v651_v56 = vrot.slane %v1422_v19, %v1458_v36  ;;  %v657_v59 = vrot.slane %v1422_v19, %v1461_v37 }
  0x69   : >> { %v665_v60 = vrot.slane %v1424_v20, %v1455_v35  ;;  %v614_v61 = vadd.f32 %v613_v33, %v609_v32  ;;  %v671_v0 = vrot.slane %v1424_v20, %v1458_v36  ;;  %v618_v1 = vsel %vm617_vm2, %v616_v51, %v615_v45 }
  0x6a   : >> { %v644_v62 = vmul.f32 %v1487_v46, %v643_v54  ;;  %v645_v63 = vmul.f32 %v1490_v47, %v643_v54  ;;  %v639_v2 = vadd.f32 %v638_v55, %v624_v30  ;;  %v652_v3 = vmul.f32 %v1507_v57, %v651_v56 }
  0x6b   : >> { %v658_v4 = vmul.f32 %v1507_v57, %v657_v59  ;;  %v659_v10 = vmul.f32 %v1510_v58, %v657_v59  ;;  %v666_v11 = vmul.f32 %v1525_v15, %v665_v60  ;;  %v672_v13 = vmul.f32 %v1525_v15, %v671_v0 }
  0x6c   : >> { %v646_v5 = vadd.f32 %v644_v62, %v630_v43  ;;  %v647_v6 = vadd.f32 %v645_v63, %v631_v52  ;;  %v653_v12 = vadd.f32 %v652_v3, %v639_v2  ;;  %v673_v14 = vmul.f32 %v1528_v16, %v671_v0 }
  0x6d   : >> { %v679_v25 = vrot.slane %v1424_v20, %v1472_v40  ;;  %v685_v28 = vrot.slane %v1426_v21, %v1455_v35  ;;  %v693_v29 = vrot.slane %v1426_v21, %v1475_v41  ;;  %v699_v33 = vrot.slane %v1426_v21, %v1472_v40 }
  0x6e   : >> { %v660_v26 = vadd.f32 %v658_v4, %v646_v5  ;;  %v661_v27 = vadd.f32 %v659_v10, %v647_v6  ;;  %v667_v30 = vadd.f32 %v666_v11, %v653_v12  ;;  %v707_v43 = vrot.slane %v1428_v22, %v1478_v42 }
  0x6f   : >> { %v680_v32 = vmul.f32 %v1548_v48, %v679_v25  ;;  %v686_v51 = vmul.f32 %v1548_v48, %v685_v28  ;;  %v687_v52 = vmul.f32 %v1555_v53, %v685_v28  ;;  %v694_v55 = vmul.f32 %v1566_v7, %v693_v29 }
  0x70   : >> { %v674_v44 = vadd.f32 %v672_v13, %v660_v26  ;;  %v675_v45 = vadd.f32 %v673_v14, %v661_v27  ;;  %v700_v56 = vmul.f32 %v1566_v7, %v699_v33  ;;  %v701_v59 = vmul.f32 %v1569_v8, %v699_v33 }
  0x71   : >> { %v681_v54 = vadd.f32 %v680_v32, %v667_v30  ;;  %v708_v63 = vmul.f32 %v1589_v49, %v707_v43  ;;  %v713_v0 = vrot.slane %v1428_v22, %v1475_v41  ;;  %v619_v2 = vadd.f32 %v618_v1, %v614_v61 }
  0x72   : >> { %v688_v60 = vadd.f32 %v686_v51, %v674_v44  ;;  %v689_v62 = vadd.f32 %v687_v52, %v675_v45  ;;  %v727_v4 = vrot.slane %v1418_v17, %v1478_v42  ;;  %v735_v5 = vrot.slane %v1418_v17, %v1475_v41 }
  0x73   : >> { %v695_v3 = vadd.f32 %v694_v55, %v681_v54  ;;  %v714_v11 = vmul.f32 %v1589_v49, %v713_v0  ;;  %v715_v12 = vmul.f32 %v1592_v50, %v713_v0  ;;  %v743_v27 = vrot.slane %v1420_v18, %v1539_v31 }
  0x74   : >> { %v702_v6 = vadd.f32 %v700_v56, %v688_v60  ;;  %v703_v10 = vadd.f32 %v701_v59, %v689_v62  ;;  %v728_v14 = vmul.f32 %v727_v4, %v1466_v38  ;;  %v729_v25 = vmul.f32 %v727_v4, %v1469_v39 }
  0x75   : >> { %v709_v13 = vadd.f32 %v708_v63, %v695_v3  ;;  %v736_v1 = vmul.f32 %v735_v5, %v1466_v38  ;;  %v737_v41 = vmul.f32 %v735_v5, %v1469_v39  ;;  %v751_v28 = vrot.slane %v1420_v18, %v1478_v42 }
  0x76   : >> { %v716_v26 = vadd.f32 %v714_v11, %v702_v6  ;;  %v717_v61 = vadd.f32 %v715_v12, %v703_v10  ;;  %v759_v29 = vrot.slane %v1422_v19, %v1572_v9  ;;  %v767_v30 = vrot.slane %v1422_v19, %v1539_v31 }
  0x77   : >> { %v718_v32 = vadd.f32 %v709_v13, %v619_v2  ;;  %v744_v33 = vmul.f32 %v1487_v46, %v743_v27  ;;  %v745_v43 = vmul.f32 %v1490_v47, %v743_v27  ;;  %vm721_vm3 = vcmp.lt.s32.totalorder %v1452_v34, 7 }
  0x78   : >> { %v752_v38 = vmul.f32 %v1487_v46, %v751_v28  ;;  %v753_v39 = vmul.f32 %v1490_v47, %v751_v28  ;;  %v760_v44 = vmul.f32 %v1507_v57, %v759_v29  ;;  %v761_v42 = vmul.f32 %v1510_v58, %v759_v29 }
  0x79   : >> { %v719_v45 = vrot.slane %v716_v26, 1  ;;  %v746_v51 = vadd.f32 %v744_v33, %v728_v14  ;;  %v747_v52 = vadd.f32 %v745_v43, %v729_v25  ;;  %v768_v31 = vmul.f32 %v1507_v57, %v767_v30 }
  0x7a   : >> { %v720_v54 = vrot.slane %v717_v61, 1  ;;  %v754_v55 = vadd.f32 %v752_v38, %v736_v1  ;;  %v755_v56 = vadd.f32 %v753_v39, %v737_v41  ;;  %v769_v59 = vmul.f32 %v1510_v58, %v767_v30 }
  0x7b   : >> { %v762_v60 = vadd.f32 %v760_v44, %v746_v51  ;;  %v763_v62 = vadd.f32 %v761_v42, %v747_v52  ;;  %v775_v46 = vrot.slane %v1424_v20, %v1461_v37  ;;  %v783_v47 = vrot.slane %v1424_v20, %v1572_v9 }
  0x7c   : >> { %v770_v63 = vadd.f32 %v768_v31, %v754_v55  ;;  %v771_v0 = vadd.f32 %v769_v59, %v755_v56  ;;  %v791_v2 = vrot.slane %v1426_v21, %v1458_v36  ;;  %v799_v57 = vrot.slane %v1426_v21, %v1461_v37 }
  0x7d   : >> { %v776_v3 = vmul.f32 %v1525_v15, %v775_v46  ;;  %v777_v58 = vmul.f32 %v1528_v16, %v775_v46  ;;  %v784_v4 = vmul.f32 %v1525_v15, %v783_v47  ;;  %v785_v5 = vmul.f32 %v1528_v16, %v783_v47 }
  0x7e   : >> { %v792_v6 = vmul.f32 %v1548_v48, %v791_v2  ;;  %v793_v9 = vmul.f32 %v1555_v53, %v791_v2  ;;  %v800_v10 = vmul.f32 %v1548_v48, %v799_v57  ;;  %v801_v11 = vmul.f32 %v1555_v53, %v799_v57 }
  0x7f   : >> { %v778_v12 = vadd.f32 %v776_v3, %v762_v60  ;;  %v779_v13 = vadd.f32 %v777_v58, %v763_v62  ;;  %v786_v14 = vadd.f32 %v784_v4, %v770_v63  ;;  %v787_v37 = vadd.f32 %v785_v5, %v771_v0 }
  0x80   : >> { %v807_v25 = vrot.slane %v1428_v22, %v1455_v35  ;;  %v815_v15 = vrot.slane %v1428_v22, %v1458_v36  ;;  %v823_v16 = vrot.slane %v1428_v22, %v1472_v40  ;;  %v832_v26 = vmul.f32 %v1430_v23, %v1589_v49 }
  0x81   : >> { %v794_v61 = vadd.f32 %v792_v6, %v778_v12  ;;  %v795_v48 = vadd.f32 %v793_v9, %v779_v13  ;;  %v802_v1 = vadd.f32 %v800_v10, %v786_v14  ;;  %v803_v53 = vadd.f32 %v801_v11, %v787_v37 }
  0x82   : >> { %v808_v27 = vmul.f32 %v1566_v7, %v807_v25  ;;  %v809_v41 = vmul.f32 %v1569_v8, %v807_v25  ;;  %v816_v28 = vmul.f32 %v1566_v7, %v815_v15  ;;  %v817_v35 = vmul.f32 %v1569_v8, %v815_v15 }
  0x83   : >> { %v722_v36 = vsel %vm721_vm3, %v719_v45, %v720_v54  ;;  %v824_v40 = vmul.f32 %v1589_v49, %v823_v16  ;;  %v825_v29 = vmul.f32 %v1592_v50, %v823_v16  ;;  %v833_v30 = vmul.f32 %v1430_v23, %v1592_v50 }
  0x84   : >> { %v810_v33 = vadd.f32 %v808_v27, %v794_v61  ;;  %v811_v43 = vadd.f32 %v809_v41, %v795_v48  ;;  %v818_v38 = vadd.f32 %v816_v28, %v802_v1  ;;  %v819_v39 = vadd.f32 %v817_v35, %v803_v53 }
  0x85   : >> { %v723_v8 = vadd.f32 %v722_v36, %v718_v32  ;;  %vm838_vm4 = vcmp.lt.s32.totalorder %v1452_v34, 6  ;;  %vm843_vm5 = vcmp.lt.s32.totalorder %v1452_v34, 5  ;;  %v856_v34 = vld [vmem:[%s1434_s14] sm:$0x1] (%p398_p2) }
  0x86   : >> { %v826_v44 = vadd.f32 %v824_v40, %v810_v33  ;;  %v827_v42 = vadd.f32 %v825_v29, %v811_v43  ;;  %v834_v7 = vadd.f32 %v832_v26, %v818_v38  ;;  %v835_v51 = vadd.f32 %v833_v30, %v819_v39  ;;  %857 = vst [vmem:[%s1444_s30] sm:$0x1] (%p398_p2), %v856_v34 }
  0x88   : >> { %v836_v49 = vrot.slane %v826_v44, 2  ;;  %v837_v45 = vrot.slane %v827_v42, 2  ;;  %v841_v52 = vrot.slane %v834_v7, 3  ;;  %v842_v31 = vrot.slane %v835_v51, 3 }
  0x8a   : >> { %v839_v54 = vsel %vm838_vm4, %v836_v49, %v837_v45  ;;  %v844_v50 = vsel %vm843_vm5, %v841_v52, %v842_v31 }
  0x8b   : >> { %v840_v55 = vadd.f32 %v839_v54, %v723_v8 }
  0x8d   : >> { %v845_v56 = vadd.f32 %v844_v50, %v840_v55  ;;  %400 = sbr.rel (!%p398_p2) target bundleno = 69 (0x45), region = 223 }
  0x8f   : >> { %v852_v59 = vadd.f32 %v1432_v24, %v845_v56 }
  0x91   : >> { %855 = vst [vmem:[%s854_s27] sm:$0xff] %v852_v59 }
  0x92   : > { %s1120_s11 = smul.u32 (%p1381_p10), 18, %s1260_s16 }
  0x94   : > { %s889_s4 = sadd.s32 (%p1381_p10), %s1264_s17, %s1120_s11 }
  0x95   : > { %s1112_s12 = sshll.u32 (%p1381_p10), %s889_s4, 3 }
  0x96   : > { %s891_s28 = scalar_lea.vmem (%p1381_p10), %s1786_s3, %s1112_s12 }
  0x98   : > { %v858_v32 = vld [vmem:[#allocation3] sm:$0xff]  ;;  %v861_v60 = vld [vmem:[#allocation3 + $0x8] sm:$0xff]  ;;  %v864_v62 = vld [vmem:[#allocation3 + $0x10] sm:$0xff]  ;;  %887 = sbr.rel (!%p1381_p10) target bundleno = 166 (0xa6), region = 119 }
  0x99   : > { %859 = vst [vmem:[%s1444_s30 + $0x1] sm:$0xff] %v858_v32  ;;  %862 = vst [vmem:[%s1444_s30 + $0x9] sm:$0xff] %v861_v60  ;;  %v867_v46 = vld [vmem:[#allocation3 + $0x18] sm:$0xff]  ;;  %v870_v47 = vld [vmem:[#allocation3 + $0x20] sm:$0xff] }
  0x9a   : > { %865 = vst [vmem:[%s1444_s30 + $0x11] sm:$0xff] %v864_v62  ;;  %868 = vst [vmem:[%s1444_s30 + $0x19] sm:$0xff] %v867_v46  ;;  %v873_v17 = vld [vmem:[#allocation3 + $0x28] sm:$0xff]  ;;  %v876_v18 = vld [vmem:[#allocation3 + $0x30] sm:$0xff] }
  0x9b   : > { %871 = vst [vmem:[%s1444_s30 + $0x21] sm:$0xff] %v870_v47  ;;  %v879_v19 = vld [vmem:[#allocation3 + $0x38] sm:$0xff]  ;;  %874 = vst [vmem:[%s1444_s30 + $0x29] sm:$0xff] %v873_v17 }
  0x9c   : > { %877 = vst [vmem:[%s1444_s30 + $0x31] sm:$0xff] %v876_v18  ;;  %880 = vst [vmem:[%s1444_s30 + $0x39] sm:$0xff] %v879_v19 }
  0xa0   : > { %v936_v20 = vld [vmem:[%s1444_s30] sm:$0xff]  ;;  %v938_v21 = vld [vmem:[%s1444_s30 + $0x8] sm:$0xff] }
  0xa1   : > { %v940_v22 = vld [vmem:[%s1444_s30 + $0x10] sm:$0xff]  ;;  %v942_v23 = vld [vmem:[%s1444_s30 + $0x18] sm:$0xff]  ;;  %937 = vst [vmem:[%s891_s28] sm:$0xff] %v936_v20  ;;  %939 = vst [vmem:[%s891_s28 + $0x10] sm:$0xff] %v938_v21 }
  0xa2   : > { %v944_v24 = vld [vmem:[%s1444_s30 + $0x20] sm:$0xff]  ;;  %v946_v63 = vld [vmem:[%s1444_s30 + $0x28] sm:$0xff]  ;;  %941 = vst [vmem:[%s891_s28 + $0x20] sm:$0xff] %v940_v22  ;;  %943 = vst [vmem:[%s891_s28 + $0x30] sm:$0xff] %v942_v23 }
  0xa3   : > { %v948_v0 = vld [vmem:[%s1444_s30 + $0x30] sm:$0xff]  ;;  %v950_v2 = vld [vmem:[%s1444_s30 + $0x38] sm:$0xff]  ;;  %v952_v57 = vld [vmem:[%s1444_s30 + $0x40] sm:$0xff]  ;;  %945 = vst [vmem:[%s891_s28 + $0x40] sm:$0xff] %v944_v24 }
  0xa4   : > { %947 = vst [vmem:[%s891_s28 + $0x50] sm:$0xff] %v946_v63  ;;  %949 = vst [vmem:[%s891_s28 + $0x60] sm:$0xff] %v948_v0 }
  0xa5   : > { %951 = vst [vmem:[%s891_s28 + $0x70] sm:$0xff] %v950_v2  ;;  %953 = vst [vmem:[%s891_s28 + $0x80] sm:$0xff] %v952_v57 }
  0xa6 PF: > { %s13_s20 = sadd.s32 1, %s1276_s20   ;;  %s1790_s12 = smov %s1248_s13 }
  0xa7   : > { %p10_p3 = scmp.ge.s32.totalorder %s13_s20, 6   ;;  %s1791_s13 = smov %s1386_s5 }
  0xa8   : > { %s1792_s14 = smov %s1256_s15  ;;  %s1793_s15 = smov %s1389_s6 }
  0xa9   : > { %s1794_s16 = smov %s1268_s18  ;;  %s1795_s17 = smov %s1272_s19 }
  0xaa   : > { %s1796_s18 = smov %s1799_s21  ;;  %s1797_s19 = smov %s1803_s22 }
  0xab   :  { %12 = sbr.rel (!%p10_p3) target bundleno = 5 (0x5), region = 234 }

</bundles_post_ra>
